<compile_context>
chip_gen: v7x
topology: tpu7x:2x2x1
jax: 0.10.0
libtpu: 0.0.40
codegen_flags: <defaults>
</compile_context>

<pallas_src>
import jax
import jax.numpy as jnp
from jax.experimental import pallas as pl
from jax.experimental.pallas import tpu as pltpu

LANE = 128
CH_ALIGN = 16                      # bf16 sublane packing: 16-row aligned channel blocks
VMEM_LIMIT = 48 * 1024 * 1024


def _round_up(x, m):
    return ((x + m - 1) // m) * m


# ------------------------------- max-pool 2x2 ----------------------------------
# TODO(synk): left as a single fused XLA reshape+reduce (memory-bound glue, ~1.25x
# ideal traffic); a reshape-free in-kernel Pallas pool needs lane-strided loads.
def maxpool2x2(x4):
    V, C, H, W = x4.shape
    return jnp.max(x4.reshape(V, C, H // 2, 2, W // 2, 2), axis=(3, 5))


# --------------------------- fused conv stage (3x3) -----------------------------

def _fold_weight(wt, cin_p):
    """[Cout, Cin, 3, 3] -> [Cout, 9*cin_p] bf16, rows ordered (tap, channel)."""
    cout, cin, kh, kw = wt.shape
    w9 = jnp.transpose(wt, (2, 3, 0, 1)).reshape(kh * kw, cout, cin)
    if cin_p != cin:
        w9 = jnp.pad(w9, ((0, 0), (0, 0), (0, cin_p - cin)))
    return jnp.transpose(w9, (1, 0, 2)).reshape(cout, kh * kw * cin_p).astype(jnp.bfloat16)


def _make_stage_kernel(cin_p, cout1, cout2, W, HW, HWp, P, use_res1):
    """relu(conv3x3 + b1 [+ x]) [ -> relu(conv3x3 + b2) ] on a zero-halo flat
    buffer.  Each conv is ONE K=9*C bf16 MXU matmul: the 9 shifted views of the
    halo buffer are stacked into a [9*C, HWp] VMEM scratch; left/right column
    wrap is removed with lane masks; the residual is the center tap (free)."""

    def im2col(halo_ref, col_ref, C, m_l, m_r):
        for t in range(9):                       # in-VMEM im2col (9 shifted views)
            dh, dw = t // 3 - 1, t % 3 - 1
            xs = halo_ref[:, pl.ds(P + dh * W + dw, HWp)]
            if dw == -1:
                xs = xs * m_l
            elif dw == 1:
                xs = xs * m_r
            col_ref[t * C:(t + 1) * C, :] = xs

    def conv1(x_ref, w1_ref, b1_ref, halo1, col1, m_l, m_r):
        halo1[...] = jnp.zeros_like(halo1)       # zero halo (prefix/suffix rows)
        halo1[:, pl.ds(P, HW)] = x_ref[...]      # in-VMEM halo assembly (no XLA pad)
        im2col(halo1, col1, cin_p, m_l, m_r)
        acc = jnp.dot(w1_ref[...], col1[...], preferred_element_type=jnp.float32)
        acc = acc + b1_ref[...]
        if use_res1:                             # residual == center tap
            acc = acc + halo1[:, pl.ds(P, HWp)].astype(jnp.float32)
        return jnp.maximum(acc, 0.0)

    def make_masks():
        lane = jax.lax.broadcasted_iota(jnp.int32, (1, HWp), 1)
        m_l = (lane % W != 0).astype(jnp.bfloat16)        # taps with dw = -1
        m_r = (lane % W != W - 1).astype(jnp.bfloat16)    # taps with dw = +1
        m_v = (lane < HW).astype(jnp.float32)             # real (non-pad) columns
        return m_l, m_r, m_v

    if cout2 is None:
        def kernel(x_ref, w1_ref, b1_ref, o_ref, halo1, col1):
            m_l, m_r, _ = make_masks()
            y = conv1(x_ref, w1_ref, b1_ref, halo1, col1, m_l, m_r)
            o_ref[...] = y.astype(o_ref.dtype)
    else:
        def kernel(x_ref, w1_ref, b1_ref, w2_ref, b2_ref, o_ref,
                   halo1, col1, halo2, col2):
            m_l, m_r, m_v = make_masks()
            y = conv1(x_ref, w1_ref, b1_ref, halo1, col1, m_l, m_r)
            mid = (y * m_v).astype(jnp.bfloat16)          # zero pad-cols before re-halo
            halo2[...] = jnp.zeros_like(halo2)
            halo2[:, pl.ds(P, HWp)] = mid                 # conv1 output stays in VMEM
            im2col(halo2, col2, cout1, m_l, m_r)
            acc = jnp.dot(w2_ref[...], col2[...], preferred_element_type=jnp.float32)
            acc = acc + b2_ref[...]
            o_ref[...] = jnp.maximum(acc, 0.0).astype(o_ref.dtype)

    return kernel


def conv_stage(x_flat, H, W, w1, b1, w2=None, b2=None, use_res1=False):
    """Fused ConvBlock (+ optional second ConvBlock) per view.
    x_flat: [V, Cin, H*W] -> [V, Cout_last, HWp] bf16 (lane-dense, HWp = ceil128)."""
    V, Cin, HW = x_flat.shape
    assert HW == H * W
    cin_p = _round_up(Cin, CH_ALIGN)
    if cin_p != Cin:
        x_flat = jnp.pad(x_flat, ((0, 0), (0, cin_p - Cin), (0, 0)))
    x_flat = x_flat.astype(jnp.bfloat16)

    HWp = _round_up(HW, LANE)
    P = _round_up(W + 1, LANE)          # lane-aligned halo prefix (>= W+1 zeros)
    L = P + HWp + P

    cout1 = w1.shape[0]
    assert cout1 % CH_ALIGN == 0
    args = [x_flat, _fold_weight(w1, cin_p),
            b1.reshape(cout1, 1).astype(jnp.float32)]
    in_specs = [
        pl.BlockSpec((None, cin_p, HW), lambda v: (v, 0, 0)),
        pl.BlockSpec((cout1, 9 * cin_p), lambda v: (0, 0)),
        pl.BlockSpec((cout1, 1), lambda v: (0, 0)),
    ]
    scratch = [pltpu.VMEM((cin_p, L), jnp.bfloat16),
               pltpu.VMEM((9 * cin_p, HWp), jnp.bfloat16)]

    if w2 is None:
        cout2 = None
        cout_last = cout1
    else:
        cout2 = w2.shape[0]
        cout_last = cout2
        args += [_fold_weight(w2, cout1),
                 b2.reshape(cout2, 1).astype(jnp.float32)]
        in_specs += [pl.BlockSpec((cout2, 9 * cout1), lambda v: (0, 0)),
                     pl.BlockSpec((cout2, 1), lambda v: (0, 0))]
        scratch += [pltpu.VMEM((cout1, L), jnp.bfloat16),
                    pltpu.VMEM((9 * cout1, HWp), jnp.bfloat16)]

    return pl.pallas_call(
        _make_stage_kernel(cin_p, cout1, cout2, W, HW, HWp, P, use_res1),
        out_shape=jax.ShapeDtypeStruct((V, cout_last, HWp), jnp.bfloat16),
        grid=(V,),
        in_specs=in_specs,
        out_specs=pl.BlockSpec((None, cout_last, HWp), lambda v: (v, 0, 0)),
        scratch_shapes=scratch,
        compiler_params=pltpu.CompilerParams(
            dimension_semantics=("parallel",),
            vmem_limit_bytes=VMEM_LIMIT),
    )(*args)


# --------------------- grid_sample + mask + concat (fused) ----------------------

def _bilinear_corners(coord, H, W):
    """coord [V, N, 1, 2] (x, y) in [-1, 1], align_corners=False, zeros padding.
    Returns corner flat indices [V, 4, N] int32 and weights [V, 4, N] f32."""
    gx = coord[:, :, 0, 0]
    gy = coord[:, :, 0, 1]
    ix = (gx + 1.0) * (W * 0.5) - 0.5
    iy = (gy + 1.0) * (H * 0.5) - 0.5
    x0 = jnp.floor(ix)
    y0 = jnp.floor(iy)
    x1 = x0 + 1.0
    y1 = y0 + 1.0
    wx1 = ix - x0
    wx0 = 1.0 - wx1
    wy1 = iy - y0
    wy0 = 1.0 - wy1
    idxs, wgts = [], []
    for xc, yc, wgt in ((x0, y0, wx0 * wy0), (x1, y0, wx1 * wy0),
                        (x0, y1, wx0 * wy1), (x1, y1, wx1 * wy1)):
        valid = (xc >= 0) & (xc <= W - 1) & (yc >= 0) & (yc <= H - 1)
        xi = jnp.clip(xc, 0, W - 1).astype(jnp.int32)
        yi = jnp.clip(yc, 0, H - 1).astype(jnp.int32)
        idxs.append(yi * W + xi)
        wgts.append(jnp.where(valid, wgt, 0.0))
    return jnp.stack(idxs, axis=1), jnp.stack(wgts, axis=1).astype(jnp.float32)


def _gather_corners(y_flat, idx):
    """y_flat [V, C, HWp], idx [V, 4, N] -> [V, 4, C, N].
    Gather operand is the feature map itself (no 4x broadcast copy)."""
    V, C, _ = y_flat.shape
    N = idx.shape[-1]
    g = jax.vmap(lambda y, i: jnp.take(y, i, axis=1))(y_flat, idx.reshape(V, 4 * N))
    return jnp.transpose(g.reshape(V, C, 4, N), (0, 2, 1, 3))


def _make_sample_kernel(c0n, c1n, c2n):
    o1, o2 = c0n, c0n + c1n

    def kernel(aux_ref, c0_ref, c1_ref, c2_ref, o_ref):
        aux = aux_ref[...]                                   # [20, Np] f32
        # sampled mask: rows 0:4 corner values, 4:8 bilinear weights
        m = (aux[0:1] * aux[4:5] + aux[1:2] * aux[5:6] +
             aux[2:3] * aux[6:7] + aux[3:4] * aux[7:8])      # [1, Np]

        def blend(c_ref, w):
            r = c_ref[0].astype(jnp.float32) * aux[w:w + 1]
            r = r + c_ref[1].astype(jnp.float32) * aux[w + 1:w + 2]
            r = r + c_ref[2].astype(jnp.float32) * aux[w + 2:w + 3]
            r = r + c_ref[3].astype(jnp.float32) * aux[w + 3:w + 4]
            return r * m

        o_ref[0:c0n, :] = blend(c0_ref, 8)
        o_ref[o1:o1 + c1n, :] = blend(c1_ref, 12)
        o_ref[o2:o2 + c2n, :] = blend(c2_ref, 16)

    return kernel


def fused_sample_mask(feat_list, hw_list, masks, sample_coord):
    """Bilinear-sample 3 feature scales and the mask at sample_coord; the blend,
    mask multiply and channel concat are fused in one kernel.
    feat_list[i]: [V, Ci, HWi_pad] bf16; masks [V, 1, H, W]; coord [V, N, 1, 2]
    -> [V, C0+C1+C2, N] f32."""
    V, N = sample_coord.shape[0], sample_coord.shape[1]
    Np = _round_up(N, LANE)

    def pad_n(a):
        return jnp.pad(a, [(0, 0)] * (a.ndim - 1) + [(0, Np - N)])

    Hm, Wm = masks.shape[2], masks.shape[3]
    mi, mw = _bilinear_corners(sample_coord, Hm, Wm)
    cm = _gather_corners(masks.reshape(V, 1, Hm * Wm), mi)[:, :, 0, :]   # [V,4,N]

    corners, weights, csz = [], [], []
    for y_flat, (Hs, Ws) in zip(feat_list, hw_list):
        csz.append(y_flat.shape[1])
        ii, ww = _bilinear_corners(sample_coord, Hs, Ws)
        corners.append(pad_n(_gather_corners(y_flat, ii)))               # [V,4,Cs,Np]
        weights.append(ww)

    # Pack all sublane-4 aux inputs into one array: rows 0:4 mask corner values,
    # 4:8 mask weights, 8:12 / 12:16 / 16:20 per-scale bilinear weights.
    aux = pad_n(jnp.concatenate([cm, mw] + weights, axis=1).astype(jnp.float32))

    Ctot = sum(csz)
    out = pl.pallas_call(
        _make_sample_kernel(*csz),
        out_shape=jax.ShapeDtypeStruct((V, Ctot, Np), jnp.float32),
        grid=(V,),
        in_specs=[pl.BlockSpec((None, 20, Np), lambda v: (v, 0, 0)),
                  pl.BlockSpec((None, 4, csz[0], Np), lambda v: (v, 0, 0, 0)),
                  pl.BlockSpec((None, 4, csz[1], Np), lambda v: (v, 0, 0, 0)),
                  pl.BlockSpec((None, 4, csz[2], Np), lambda v: (v, 0, 0, 0))],
        out_specs=pl.BlockSpec((None, Ctot, Np), lambda v: (v, 0, 0)),
        compiler_params=pltpu.CompilerParams(dimension_semantics=("parallel",)),
    )(aux, corners[0], corners[1], corners[2])
    return out[:, :, :N]


# -------------------------------- parameters ------------------------------------

def xavier_uniform(key, shape):
    cout, cin, kh, kw = shape
    fan_in = cin * kh * kw
    fan_out = cout * kh * kw
    bound = (6.0 / (fan_in + fan_out)) ** 0.5
    return jax.random.uniform(key, shape, jnp.float32, -bound, bound)


def init_backbone_params(key, in_feat, kernel=3):
    keys = jax.random.split(key, 5)
    p = {}
    p["init_w"] = xavier_uniform(keys[0], (16, in_feat, kernel, kernel))
    p["init_b"] = jnp.zeros((16,), jnp.float32)
    p["l1_c1_w"] = xavier_uniform(keys[1], (16, 16, kernel, kernel))
    p["l1_c1_b"] = jnp.zeros((16,), jnp.float32)
    p["l1_c2_w"] = xavier_uniform(keys[2], (16, 16, kernel, kernel))
    p["l1_c2_b"] = jnp.zeros((16,), jnp.float32)
    p["l2_c1_w"] = xavier_uniform(keys[3], (32, 16, kernel, kernel))
    p["l2_c1_b"] = jnp.zeros((32,), jnp.float32)
    p["l2_c2_w"] = xavier_uniform(keys[4], (32, 32, kernel, kernel))
    p["l2_c2_b"] = jnp.zeros((32,), jnp.float32)
    return p


# ---------------------------------- forward -------------------------------------

def _to_4d(y_flat_padded, C, H, W):
    HW = H * W
    y = y_flat_padded if y_flat_padded.shape[-1] == HW else y_flat_padded[:, :, :HW]
    return y.reshape(y.shape[0], C, H, W)


def backbone_forward(params, x, masks, sample_coord):
    """x [V, Cin, H, W], masks [V, 1, H, W], sample_coord [V, N, 1, 2]
       -> [V, 16+16+32, N]"""
    V, Cin, H, W = x.shape

    # init: pool + ConvBlock(Cin -> 16, no residual)
    H0, W0 = H // 2, W // 2
    p0 = maxpool2x2(x).astype(jnp.bfloat16)
    y0 = conv_stage(p0.reshape(V, Cin, H0 * W0), H0, W0,
                    params["init_w"], params["init_b"])

    # layer1: DownModule(16 -> 16); conv1 has residual; conv1+conv2 fused
    H1, W1 = H0 // 2, W0 // 2
    p1 = maxpool2x2(_to_4d(y0, 16, H0, W0))
    y1 = conv_stage(p1.reshape(V, 16, H1 * W1), H1, W1,
                    params["l1_c1_w"], params["l1_c1_b"],
                    params["l1_c2_w"], params["l1_c2_b"], use_res1=True)

    # layer2: DownModule(16 -> 32); no residual (16 != 32); conv1+conv2 fused
    H2, W2 = H1 // 2, W1 // 2
    p2 = maxpool2x2(_to_4d(y1, 16, H1, W1))
    y2 = conv_stage(p2.reshape(V, 16, H2 * W2), H2, W2,
                    params["l2_c1_w"], params["l2_c1_b"],
                    params["l2_c2_w"], params["l2_c2_b"], use_res1=False)

    # fused grid_sample (3 scales) * sampled mask, concatenated over channels
    return fused_sample_mask([y0, y1, y2],
                             [(H0, W0), (H1, W1), (H2, W2)],
                             masks, sample_coord)


if __name__ == "__main__":
    key = jax.random.PRNGKey(0)
    k_param, k_x, k_m, k_c = jax.random.split(key, 4)
    V, C_in, H, W, N = 2, 4, 16, 16, 8

    params = init_backbone_params(k_param, C_in)
    x = jax.random.normal(k_x, (V, C_in, H, W), jnp.float32)
    masks = (jax.random.uniform(k_m, (V, 1, H, W)) > 0.5).astype(jnp.float32)
    sample_coord = jax.random.uniform(k_c, (V, N, 1, 2), jnp.float32, -1.0, 1.0)

    out = jax.jit(backbone_forward)(params, x, masks, sample_coord)
    out = jax.block_until_ready(out)
    assert out.shape == (V, 16 + 16 + 32, N)
    assert bool(jnp.all(jnp.isfinite(out)))
    print("KERNEL_OK")
</pallas_src>

<mosaic_0001>
module attributes {stable_mosaic.version = 11 : i64} {
  func.func @kernel(%arg0: i32, %arg1: memref<1x16x64xbf16, #tpu.memory_space<vmem>>, %arg2: memref<16x144xbf16, #tpu.memory_space<vmem>>, %arg3: memref<16x1xf32, #tpu.memory_space<vmem>>, %arg4: memref<1x16x128xbf16, #tpu.memory_space<vmem>>, %arg5: memref<16x384xbf16, #tpu.memory_space<vmem>>, %arg6: memref<144x128xbf16, #tpu.memory_space<vmem>>) attributes {dimension_semantics = [#tpu.dimension_semantics<parallel>], iteration_bounds = array<i64: 2>, scalar_prefetch = 0 : i64, scratch_operands = 2 : i64, tpu.core_type = #tpu.core_type<tc>, window_params = [{transform_indices = @transform_0, window_bounds = array<i64: 1, 16, 64>}, {pipeline_mode = #tpu.pipeline_mode<synchronous>, transform_indices = @transform_1, window_bounds = array<i64: 16, 144>}, {pipeline_mode = #tpu.pipeline_mode<synchronous>, transform_indices = @transform_2, window_bounds = array<i64: 16, 1>}, {transform_indices = @transform_3, window_bounds = array<i64: 1, 16, 128>}]} {
    %0 = tpu.iota {dimensions = array<i32: 1>} : vector<1x128xi32>
    %c8_i32 = arith.constant 8 : i32
    %c0_i32 = arith.constant 0 : i32
    %1 = arith.cmpi eq, %c8_i32, %c0_i32 : i32
    %c1_i32 = arith.constant 1 : i32
    %2 = arith.select %1, %c1_i32, %c8_i32 : i32
    %3 = vector.broadcast %2 : i32 to vector<1x128xi32>
    %4 = arith.remsi %0, %3 : vector<1x128xi32>
    %c0_i32_0 = arith.constant 0 : i32
    %5 = vector.broadcast %c0_i32_0 : i32 to vector<1x128xi32>
    %6 = arith.cmpi ne, %4, %5 : vector<1x128xi32>
    %c0_i32_1 = arith.constant 0 : i32
    %7 = vector.broadcast %c0_i32_1 : i32 to vector<1x128xi32>
    %8 = arith.cmpi slt, %4, %7 : vector<1x128xi32>
    %c0_i32_2 = arith.constant 0 : i32
    %9 = arith.cmpi slt, %2, %c0_i32_2 : i32
    %10 = vector.broadcast %9 : i1 to vector<1x128xi1>
    %11 = vector.broadcast %10 : vector<1x128xi1> to vector<1x128xi1>
    %12 = arith.xori %8, %11 : vector<1x128xi1>
    %13 = arith.andi %12, %6 : vector<1x128xi1>
    %14 = vector.broadcast %2 : i32 to vector<1x128xi32>
    %15 = arith.addi %4, %14 : vector<1x128xi32>
    %16 = arith.select %13, %15, %4 : vector<1x128xi1>, vector<1x128xi32>
    %c0_i32_3 = arith.constant 0 : i32
    %17 = vector.broadcast %c0_i32_3 : i32 to vector<1x128xi32>
    %18 = arith.cmpi ne, %16, %17 : vector<1x128xi32>
    %19 = arith.extui %18 : vector<1x128xi1> to vector<1x128xi32>
    %20 = arith.sitofp %19 : vector<1x128xi32> to vector<1x128xf32>
    %21 = arith.truncf %20 : vector<1x128xf32> to vector<1x128xbf16>
    %c8_i32_4 = arith.constant 8 : i32
    %c0_i32_5 = arith.constant 0 : i32
    %22 = arith.cmpi eq, %c8_i32_4, %c0_i32_5 : i32
    %c1_i32_6 = arith.constant 1 : i32
    %23 = arith.select %22, %c1_i32_6, %c8_i32_4 : i32
    %24 = vector.broadcast %23 : i32 to vector<1x128xi32>
    %25 = arith.remsi %0, %24 : vector<1x128xi32>
    %c0_i32_7 = arith.constant 0 : i32
    %26 = vector.broadcast %c0_i32_7 : i32 to vector<1x128xi32>
    %27 = arith.cmpi ne, %25, %26 : vector<1x128xi32>
    %c0_i32_8 = arith.constant 0 : i32
    %28 = vector.broadcast %c0_i32_8 : i32 to vector<1x128xi32>
    %29 = arith.cmpi slt, %25, %28 : vector<1x128xi32>
    %c0_i32_9 = arith.constant 0 : i32
    %30 = arith.cmpi slt, %23, %c0_i32_9 : i32
    %31 = vector.broadcast %30 : i1 to vector<1x128xi1>
    %32 = vector.broadcast %31 : vector<1x128xi1> to vector<1x128xi1>
    %33 = arith.xori %29, %32 : vector<1x128xi1>
    %34 = arith.andi %33, %27 : vector<1x128xi1>
    %35 = vector.broadcast %23 : i32 to vector<1x128xi32>
    %36 = arith.addi %25, %35 : vector<1x128xi32>
    %37 = arith.select %34, %36, %25 : vector<1x128xi1>, vector<1x128xi32>
    %c7_i32 = arith.constant 7 : i32
    %38 = vector.broadcast %c7_i32 : i32 to vector<1x128xi32>
    %39 = arith.cmpi ne, %37, %38 : vector<1x128xi32>
    %40 = arith.extui %39 : vector<1x128xi1> to vector<1x128xi32>
    %41 = arith.sitofp %40 : vector<1x128xi32> to vector<1x128xf32>
    %42 = arith.truncf %41 : vector<1x128xf32> to vector<1x128xbf16>
    %cst = arith.constant 0.000000e+00 : bf16
    %43 = vector.broadcast %cst : bf16 to vector<16x384xbf16>
    %c0 = arith.constant 0 : index
    %c0_10 = arith.constant 0 : index
    %44 = vector.load %arg5[%c0, %c0_10] : memref<16x384xbf16, #tpu.memory_space<vmem>>, vector<16x384xbf16>
    tpu.vector_store %arg5[%c0, %c0_10], %43 {strides = array<i32>} : memref<16x384xbf16, #tpu.memory_space<vmem>>, vector<16x384xbf16>,
    %c0_11 = arith.constant 0 : index
    %c0_12 = arith.constant 0 : index
    %c0_13 = arith.constant 0 : index
    %45 = vector.load %arg1[%c0_11, %c0_12, %c0_13] : memref<1x16x64xbf16, #tpu.memory_space<vmem>>, vector<1x16x64xbf16>
    %46 = vector.shape_cast %45 : vector<1x16x64xbf16> to vector<16x64xbf16>
    %c0_14 = arith.constant 0 : index
    %c128 = arith.constant 128 : index
    %47 = vector.load %arg5[%c0_14, %c128] : memref<16x384xbf16, #tpu.memory_space<vmem>>, vector<16x64xbf16>
    tpu.vector_store %arg5[%c0_14, %c128], %46 {strides = array<i32>} : memref<16x384xbf16, #tpu.memory_space<vmem>>, vector<16x64xbf16>,
    %c0_15 = arith.constant 0 : index
    %c119 = arith.constant 119 : index
    %48 = vector.load %arg5[%c0_15, %c119] : memref<16x384xbf16, #tpu.memory_space<vmem>>, vector<16x128xbf16>
    %49 = vector.broadcast %21 : vector<1x128xbf16> to vector<16x128xbf16>
    %50 = arith.mulf %48, %49 : vector<16x128xbf16>
    %c0_16 = arith.constant 0 : index
    %c0_17 = arith.constant 0 : index
    %51 = vector.load %arg6[%c0_16, %c0_17] : memref<144x128xbf16, #tpu.memory_space<vmem>>, vector<16x128xbf16>
    tpu.vector_store %arg6[%c0_16, %c0_17], %50 {strides = array<i32>} : memref<144x128xbf16, #tpu.memory_space<vmem>>, vector<16x128xbf16>,
    %c0_18 = arith.constant 0 : index
    %c120 = arith.constant 120 : index
    %52 = vector.load %arg5[%c0_18, %c120] : memref<16x384xbf16, #tpu.memory_space<vmem>>, vector<16x128xbf16>
    %c16 = arith.constant 16 : index
    %c0_19 = arith.constant 0 : index
    %53 = vector.load %arg6[%c16, %c0_19] : memref<144x128xbf16, #tpu.memory_space<vmem>>, vector<16x128xbf16>
    tpu.vector_store %arg6[%c16, %c0_19], %52 {strides = array<i32>} : memref<144x128xbf16, #tpu.memory_space<vmem>>, vector<16x128xbf16>,
    %c0_20 = arith.constant 0 : index
    %c121 = arith.constant 121 : index
    %54 = vector.load %arg5[%c0_20, %c121] : memref<16x384xbf16, #tpu.memory_space<vmem>>, vector<16x128xbf16>
    %55 = vector.broadcast %42 : vector<1x128xbf16> to vector<16x128xbf16>
    %56 = arith.mulf %54, %55 : vector<16x128xbf16>
    %c32 = arith.constant 32 : index
    %c0_21 = arith.constant 0 : index
    %57 = vector.load %arg6[%c32, %c0_21] : memref<144x128xbf16, #tpu.memory_space<vmem>>, vector<16x128xbf16>
    tpu.vector_store %arg6[%c32, %c0_21], %56 {strides = array<i32>} : memref<144x128xbf16, #tpu.memory_space<vmem>>, vector<16x128xbf16>,
    %c0_22 = arith.constant 0 : index
    %c127 = arith.constant 127 : index
    %58 = vector.load %arg5[%c0_22, %c127] : memref<16x384xbf16, #tpu.memory_space<vmem>>, vector<16x128xbf16>
    %59 = vector.broadcast %21 : vector<1x128xbf16> to vector<16x128xbf16>
    %60 = arith.mulf %58, %59 : vector<16x128xbf16>
    %c48 = arith.constant 48 : index
    %c0_23 = arith.constant 0 : index
    %61 = vector.load %arg6[%c48, %c0_23] : memref<144x128xbf16, #tpu.memory_space<vmem>>, vector<16x128xbf16>
    tpu.vector_store %arg6[%c48, %c0_23], %60 {strides = array<i32>} : memref<144x128xbf16, #tpu.memory_space<vmem>>, vector<16x128xbf16>,
    %c0_24 = arith.constant 0 : index
    %c128_25 = arith.constant 128 : index
    %62 = vector.load %arg5[%c0_24, %c128_25] : memref<16x384xbf16, #tpu.memory_space<vmem>>, vector<16x128xbf16>
    %c64 = arith.constant 64 : index
    %c0_26 = arith.constant 0 : index
    %63 = vector.load %arg6[%c64, %c0_26] : memref<144x128xbf16, #tpu.memory_space<vmem>>, vector<16x128xbf16>
    tpu.vector_store %arg6[%c64, %c0_26], %62 {strides = array<i32>} : memref<144x128xbf16, #tpu.memory_space<vmem>>, vector<16x128xbf16>,
    %c0_27 = arith.constant 0 : index
    %c129 = arith.constant 129 : index
    %64 = vector.load %arg5[%c0_27, %c129] : memref<16x384xbf16, #tpu.memory_space<vmem>>, vector<16x128xbf16>
    %65 = vector.broadcast %42 : vector<1x128xbf16> to vector<16x128xbf16>
    %66 = arith.mulf %64, %65 : vector<16x128xbf16>
    %c80 = arith.constant 80 : index
    %c0_28 = arith.constant 0 : index
    %67 = vector.load %arg6[%c80, %c0_28] : memref<144x128xbf16, #tpu.memory_space<vmem>>, vector<16x128xbf16>
    tpu.vector_store %arg6[%c80, %c0_28], %66 {strides = array<i32>} : memref<144x128xbf16, #tpu.memory_space<vmem>>, vector<16x128xbf16>,
    %c0_29 = arith.constant 0 : index
    %c135 = arith.constant 135 : index
    %68 = vector.load %arg5[%c0_29, %c135] : memref<16x384xbf16, #tpu.memory_space<vmem>>, vector<16x128xbf16>
    %69 = vector.broadcast %21 : vector<1x128xbf16> to vector<16x128xbf16>
    %70 = arith.mulf %68, %69 : vector<16x128xbf16>
    %c96 = arith.constant 96 : index
    %c0_30 = arith.constant 0 : index
    %71 = vector.load %arg6[%c96, %c0_30] : memref<144x128xbf16, #tpu.memory_space<vmem>>, vector<16x128xbf16>
    tpu.vector_store %arg6[%c96, %c0_30], %70 {strides = array<i32>} : memref<144x128xbf16, #tpu.memory_space<vmem>>, vector<16x128xbf16>,
    %c0_31 = arith.constant 0 : index
    %c136 = arith.constant 136 : index
    %72 = vector.load %arg5[%c0_31, %c136] : memref<16x384xbf16, #tpu.memory_space<vmem>>, vector<16x128xbf16>
    %c112 = arith.constant 112 : index
    %c0_32 = arith.constant 0 : index
    %73 = vector.load %arg6[%c112, %c0_32] : memref<144x128xbf16, #tpu.memory_space<vmem>>, vector<16x128xbf16>
    tpu.vector_store %arg6[%c112, %c0_32], %72 {strides = array<i32>} : memref<144x128xbf16, #tpu.memory_space<vmem>>, vector<16x128xbf16>,
    %c0_33 = arith.constant 0 : index
    %c137 = arith.constant 137 : index
    %74 = vector.load %arg5[%c0_33, %c137] : memref<16x384xbf16, #tpu.memory_space<vmem>>, vector<16x128xbf16>
    %75 = vector.broadcast %42 : vector<1x128xbf16> to vector<16x128xbf16>
    %76 = arith.mulf %74, %75 : vector<16x128xbf16>
    %c128_34 = arith.constant 128 : index
    %c0_35 = arith.constant 0 : index
    %77 = vector.load %arg6[%c128_34, %c0_35] : memref<144x128xbf16, #tpu.memory_space<vmem>>, vector<16x128xbf16>
    tpu.vector_store %arg6[%c128_34, %c0_35], %76 {strides = array<i32>} : memref<144x128xbf16, #tpu.memory_space<vmem>>, vector<16x128xbf16>,
    %c0_36 = arith.constant 0 : index
    %c0_37 = arith.constant 0 : index
    %78 = vector.load %arg2[%c0_36, %c0_37] : memref<16x144xbf16, #tpu.memory_space<vmem>>, vector<16x144xbf16>
    %c0_38 = arith.constant 0 : index
    %c0_39 = arith.constant 0 : index
    %79 = vector.load %arg6[%c0_38, %c0_39] : memref<144x128xbf16, #tpu.memory_space<vmem>>, vector<144x128xbf16>
    %cst_40 = arith.constant dense<0.000000e+00> : vector<16x128xf32>
    %80 = tpu.matmul %78, %79, %cst_40 {dimension_numbers = #tpu.dot_dimension_numbers<[1], [0], [0], [1], [0, 0, 1, 1], [], []>} : vector<16x144xbf16>, vector<144x128xbf16>, vector<16x128xf32> -> vector<16x128xf32>
    %c0_41 = arith.constant 0 : index
    %c0_42 = arith.constant 0 : index
    %81 = vector.load %arg3[%c0_41, %c0_42] : memref<16x1xf32, #tpu.memory_space<vmem>>, vector<16x1xf32>
    %82 = vector.broadcast %81 : vector<16x1xf32> to vector<16x128xf32>
    %83 = arith.addf %80, %82 : vector<16x128xf32>
    %cst_43 = arith.constant 0.000000e+00 : f32
    %84 = vector.broadcast %cst_43 : f32 to vector<16x128xf32>
    %85 = arith.maximumf %83, %84 : vector<16x128xf32>
    %86 = arith.truncf %85 : vector<16x128xf32> to vector<16x128xbf16>
    %c0_44 = arith.constant 0 : index
    %c0_45 = arith.constant 0 : index
    %c0_46 = arith.constant 0 : index
    %87 = vector.load %arg4[%c0_44, %c0_45, %c0_46] : memref<1x16x128xbf16, #tpu.memory_space<vmem>>, vector<1x16x128xbf16>
    %88 = vector.shape_cast %87 : vector<1x16x128xbf16> to vector<16x128xbf16>
    %89 = vector.shape_cast %86 : vector<16x128xbf16> to vector<1x16x128xbf16>
    tpu.vector_store %arg4[%c0_44, %c0_45, %c0_46], %89 {strides = array<i32>} : memref<1x16x128xbf16, #tpu.memory_space<vmem>>, vector<1x16x128xbf16>,
    return
  }
  func.func @transform_0(%arg0: i32) -> (i32, i32, i32) {
    %c0_i32 = arith.constant 0 : i32
    %c0_i32_0 = arith.constant 0 : i32
    %c0_i32_1 = arith.constant 0 : i32
    return %arg0, %c0_i32, %c0_i32_0 : i32, i32, i32
  }
  func.func @transform_1(%arg0: i32) -> (i32, i32) {
    %c0_i32 = arith.constant 0 : i32
    %c0_i32_0 = arith.constant 0 : i32
    %c0_i32_1 = arith.constant 0 : i32
    return %c0_i32, %c0_i32_0 : i32, i32
  }
  func.func @transform_2(%arg0: i32) -> (i32, i32) {
    %c0_i32 = arith.constant 0 : i32
    %c0_i32_0 = arith.constant 0 : i32
    %c0_i32_1 = arith.constant 0 : i32
    return %c0_i32, %c0_i32_0 : i32, i32
  }
  func.func @transform_3(%arg0: i32) -> (i32, i32, i32) {
    %c0_i32 = arith.constant 0 : i32
    %c0_i32_0 = arith.constant 0 : i32
    %c0_i32_1 = arith.constant 0 : i32
    return %arg0, %c0_i32, %c0_i32_0 : i32, i32, i32
  }
}

module attributes {stable_mosaic.version = 11 : i64} {
  func.func @kernel(%arg0: i32, %arg1: memref<1x16x16xbf16, #tpu.memory_space<vmem>>, %arg2: memref<16x144xbf16, #tpu.memory_space<vmem>>, %arg3: memref<16x1xf32, #tpu.memory_space<vmem>>, %arg4: memref<16x144xbf16, #tpu.memory_space<vmem>>, %arg5: memref<16x1xf32, #tpu.memory_space<vmem>>, %arg6: memref<1x16x128xbf16, #tpu.memory_space<vmem>>, %arg7: memref<16x384xbf16, #tpu.memory_space<vmem>>, %arg8: memref<144x128xbf16, #tpu.memory_space<vmem>>, %arg9: memref<16x384xbf16, #tpu.memory_space<vmem>>, %arg10: memref<144x128xbf16, #tpu.memory_space<vmem>>) attributes {dimension_semantics = [#tpu.dimension_semantics<parallel>], iteration_bounds = array<i64: 2>, scalar_prefetch = 0 : i64, scratch_operands = 4 : i64, tpu.core_type = #tpu.core_type<tc>, window_params = [{transform_indices = @transform_0, window_bounds = array<i64: 1, 16, 16>}, {pipeline_mode = #tpu.pipeline_mode<synchronous>, transform_indices = @transform_1, window_bounds = array<i64: 16, 144>}, {pipeline_mode = #tpu.pipeline_mode<synchronous>, transform_indices = @transform_2, window_bounds = array<i64: 16, 1>}, {pipeline_mode = #tpu.pipeline_mode<synchronous>, transform_indices = @transform_3, window_bounds = array<i64: 16, 144>}, {pipeline_mode = #tpu.pipeline_mode<synchronous>, transform_indices = @transform_4, window_bounds = array<i64: 16, 1>}, {transform_indices = @transform_5, window_bounds = array<i64: 1, 16, 128>}]} {
    %0 = tpu.iota {dimensions = array<i32: 1>} : vector<1x128xi32>
    %c4_i32 = arith.constant 4 : i32
    %c0_i32 = arith.constant 0 : i32
    %1 = arith.cmpi eq, %c4_i32, %c0_i32 : i32
    %c1_i32 = arith.constant 1 : i32
    %2 = arith.select %1, %c1_i32, %c4_i32 : i32
    %3 = vector.broadcast %2 : i32 to vector<1x128xi32>
    %4 = arith.remsi %0, %3 : vector<1x128xi32>
    %c0_i32_0 = arith.constant 0 : i32
    %5 = vector.broadcast %c0_i32_0 : i32 to vector<1x128xi32>
    %6 = arith.cmpi ne, %4, %5 : vector<1x128xi32>
    %c0_i32_1 = arith.constant 0 : i32
    %7 = vector.broadcast %c0_i32_1 : i32 to vector<1x128xi32>
    %8 = arith.cmpi slt, %4, %7 : vector<1x128xi32>
    %c0_i32_2 = arith.constant 0 : i32
    %9 = arith.cmpi slt, %2, %c0_i32_2 : i32
    %10 = vector.broadcast %9 : i1 to vector<1x128xi1>
    %11 = vector.broadcast %10 : vector<1x128xi1> to vector<1x128xi1>
    %12 = arith.xori %8, %11 : vector<1x128xi1>
    %13 = arith.andi %12, %6 : vector<1x128xi1>
    %14 = vector.broadcast %2 : i32 to vector<1x128xi32>
    %15 = arith.addi %4, %14 : vector<1x128xi32>
    %16 = arith.select %13, %15, %4 : vector<1x128xi1>, vector<1x128xi32>
    %c0_i32_3 = arith.constant 0 : i32
    %17 = vector.broadcast %c0_i32_3 : i32 to vector<1x128xi32>
    %18 = arith.cmpi ne, %16, %17 : vector<1x128xi32>
    %19 = arith.extui %18 : vector<1x128xi1> to vector<1x128xi32>
    %20 = arith.sitofp %19 : vector<1x128xi32> to vector<1x128xf32>
    %21 = arith.truncf %20 : vector<1x128xf32> to vector<1x128xbf16>
    %c4_i32_4 = arith.constant 4 : i32
    %c0_i32_5 = arith.constant 0 : i32
    %22 = arith.cmpi eq, %c4_i32_4, %c0_i32_5 : i32
    %c1_i32_6 = arith.constant 1 : i32
    %23 = arith.select %22, %c1_i32_6, %c4_i32_4 : i32
    %24 = vector.broadcast %23 : i32 to vector<1x128xi32>
    %25 = arith.remsi %0, %24 : vector<1x128xi32>
    %c0_i32_7 = arith.constant 0 : i32
    %26 = vector.broadcast %c0_i32_7 : i32 to vector<1x128xi32>
    %27 = arith.cmpi ne, %25, %26 : vector<1x128xi32>
    %c0_i32_8 = arith.constant 0 : i32
    %28 = vector.broadcast %c0_i32_8 : i32 to vector<1x128xi32>
    %29 = arith.cmpi slt, %25, %28 : vector<1x128xi32>
    %c0_i32_9 = arith.constant 0 : i32
    %30 = arith.cmpi slt, %23, %c0_i32_9 : i32
    %31 = vector.broadcast %30 : i1 to vector<1x128xi1>
    %32 = vector.broadcast %31 : vector<1x128xi1> to vector<1x128xi1>
    %33 = arith.xori %29, %32 : vector<1x128xi1>
    %34 = arith.andi %33, %27 : vector<1x128xi1>
    %35 = vector.broadcast %23 : i32 to vector<1x128xi32>
    %36 = arith.addi %25, %35 : vector<1x128xi32>
    %37 = arith.select %34, %36, %25 : vector<1x128xi1>, vector<1x128xi32>
    %c3_i32 = arith.constant 3 : i32
    %38 = vector.broadcast %c3_i32 : i32 to vector<1x128xi32>
    %39 = arith.cmpi ne, %37, %38 : vector<1x128xi32>
    %40 = arith.extui %39 : vector<1x128xi1> to vector<1x128xi32>
    %41 = arith.sitofp %40 : vector<1x128xi32> to vector<1x128xf32>
    %42 = arith.truncf %41 : vector<1x128xf32> to vector<1x128xbf16>
    %c16_i32 = arith.constant 16 : i32
    %43 = vector.broadcast %c16_i32 : i32 to vector<1x128xi32>
    %44 = arith.cmpi slt, %0, %43 : vector<1x128xi32>
    %45 = arith.extui %44 : vector<1x128xi1> to vector<1x128xi32>
    %46 = arith.sitofp %45 : vector<1x128xi32> to vector<1x128xf32>
    %cst = arith.constant 0.000000e+00 : bf16
    %47 = vector.broadcast %cst : bf16 to vector<16x384xbf16>
    %c0 = arith.constant 0 : index
    %c0_10 = arith.constant 0 : index
    %48 = vector.load %arg7[%c0, %c0_10] : memref<16x384xbf16, #tpu.memory_space<vmem>>, vector<16x384xbf16>
    tpu.vector_store %arg7[%c0, %c0_10], %47 {strides = array<i32>} : memref<16x384xbf16, #tpu.memory_space<vmem>>, vector<16x384xbf16>,
    %c0_11 = arith.constant 0 : index
    %c0_12 = arith.constant 0 : index
    %c0_13 = arith.constant 0 : index
    %49 = vector.load %arg1[%c0_11, %c0_12, %c0_13] : memref<1x16x16xbf16, #tpu.memory_space<vmem>>, vector<1x16x16xbf16>
    %50 = vector.shape_cast %49 : vector<1x16x16xbf16> to vector<16x16xbf16>
    %c0_14 = arith.constant 0 : index
    %c128 = arith.constant 128 : index
    %51 = vector.load %arg7[%c0_14, %c128] : memref<16x384xbf16, #tpu.memory_space<vmem>>, vector<16x16xbf16>
    tpu.vector_store %arg7[%c0_14, %c128], %50 {strides = array<i32>} : memref<16x384xbf16, #tpu.memory_space<vmem>>, vector<16x16xbf16>,
    %c0_15 = arith.constant 0 : index
    %c123 = arith.constant 123 : index
    %52 = vector.load %arg7[%c0_15, %c123] : memref<16x384xbf16, #tpu.memory_space<vmem>>, vector<16x128xbf16>
    %53 = vector.broadcast %21 : vector<1x128xbf16> to vector<16x128xbf16>
    %54 = arith.mulf %52, %53 : vector<16x128xbf16>
    %c0_16 = arith.constant 0 : index
    %c0_17 = arith.constant 0 : index
    %55 = vector.load %arg8[%c0_16, %c0_17] : memref<144x128xbf16, #tpu.memory_space<vmem>>, vector<16x128xbf16>
    tpu.vector_store %arg8[%c0_16, %c0_17], %54 {strides = array<i32>} : memref<144x128xbf16, #tpu.memory_space<vmem>>, vector<16x128xbf16>,
    %c0_18 = arith.constant 0 : index
    %c124 = arith.constant 124 : index
    %56 = vector.load %arg7[%c0_18, %c124] : memref<16x384xbf16, #tpu.memory_space<vmem>>, vector<16x128xbf16>
    %c16 = arith.constant 16 : index
    %c0_19 = arith.constant 0 : index
    %57 = vector.load %arg8[%c16, %c0_19] : memref<144x128xbf16, #tpu.memory_space<vmem>>, vector<16x128xbf16>
    tpu.vector_store %arg8[%c16, %c0_19], %56 {strides = array<i32>} : memref<144x128xbf16, #tpu.memory_space<vmem>>, vector<16x128xbf16>,
    %c0_20 = arith.constant 0 : index
    %c125 = arith.constant 125 : index
    %58 = vector.load %arg7[%c0_20, %c125] : memref<16x384xbf16, #tpu.memory_space<vmem>>, vector<16x128xbf16>
    %59 = vector.broadcast %42 : vector<1x128xbf16> to vector<16x128xbf16>
    %60 = arith.mulf %58, %59 : vector<16x128xbf16>
    %c32 = arith.constant 32 : index
    %c0_21 = arith.constant 0 : index
    %61 = vector.load %arg8[%c32, %c0_21] : memref<144x128xbf16, #tpu.memory_space<vmem>>, vector<16x128xbf16>
    tpu.vector_store %arg8[%c32, %c0_21], %60 {strides = array<i32>} : memref<144x128xbf16, #tpu.memory_space<vmem>>, vector<16x128xbf16>,
    %c0_22 = arith.constant 0 : index
    %c127 = arith.constant 127 : index
    %62 = vector.load %arg7[%c0_22, %c127] : memref<16x384xbf16, #tpu.memory_space<vmem>>, vector<16x128xbf16>
    %63 = vector.broadcast %21 : vector<1x128xbf16> to vector<16x128xbf16>
    %64 = arith.mulf %62, %63 : vector<16x128xbf16>
    %c48 = arith.constant 48 : index
    %c0_23 = arith.constant 0 : index
    %65 = vector.load %arg8[%c48, %c0_23] : memref<144x128xbf16, #tpu.memory_space<vmem>>, vector<16x128xbf16>
    tpu.vector_store %arg8[%c48, %c0_23], %64 {strides = array<i32>} : memref<144x128xbf16, #tpu.memory_space<vmem>>, vector<16x128xbf16>,
    %c0_24 = arith.constant 0 : index
    %c128_25 = arith.constant 128 : index
    %66 = vector.load %arg7[%c0_24, %c128_25] : memref<16x384xbf16, #tpu.memory_space<vmem>>, vector<16x128xbf16>
    %c64 = arith.constant 64 : index
    %c0_26 = arith.constant 0 : index
    %67 = vector.load %arg8[%c64, %c0_26] : memref<144x128xbf16, #tpu.memory_space<vmem>>, vector<16x128xbf16>
    tpu.vector_store %arg8[%c64, %c0_26], %66 {strides = array<i32>} : memref<144x128xbf16, #tpu.memory_space<vmem>>, vector<16x128xbf16>,
    %c0_27 = arith.constant 0 : index
    %c129 = arith.constant 129 : index
    %68 = vector.load %arg7[%c0_27, %c129] : memref<16x384xbf16, #tpu.memory_space<vmem>>, vector<16x128xbf16>
    %69 = vector.broadcast %42 : vector<1x128xbf16> to vector<16x128xbf16>
    %70 = arith.mulf %68, %69 : vector<16x128xbf16>
    %c80 = arith.constant 80 : index
    %c0_28 = arith.constant 0 : index
    %71 = vector.load %arg8[%c80, %c0_28] : memref<144x128xbf16, #tpu.memory_space<vmem>>, vector<16x128xbf16>
    tpu.vector_store %arg8[%c80, %c0_28], %70 {strides = array<i32>} : memref<144x128xbf16, #tpu.memory_space<vmem>>, vector<16x128xbf16>,
    %c0_29 = arith.constant 0 : index
    %c131 = arith.constant 131 : index
    %72 = vector.load %arg7[%c0_29, %c131] : memref<16x384xbf16, #tpu.memory_space<vmem>>, vector<16x128xbf16>
    %73 = vector.broadcast %21 : vector<1x128xbf16> to vector<16x128xbf16>
    %74 = arith.mulf %72, %73 : vector<16x128xbf16>
    %c96 = arith.constant 96 : index
    %c0_30 = arith.constant 0 : index
    %75 = vector.load %arg8[%c96, %c0_30] : memref<144x128xbf16, #tpu.memory_space<vmem>>, vector<16x128xbf16>
    tpu.vector_store %arg8[%c96, %c0_30], %74 {strides = array<i32>} : memref<144x128xbf16, #tpu.memory_space<vmem>>, vector<16x128xbf16>,
    %c0_31 = arith.constant 0 : index
    %c132 = arith.constant 132 : index
    %76 = vector.load %arg7[%c0_31, %c132] : memref<16x384xbf16, #tpu.memory_space<vmem>>, vector<16x128xbf16>
    %c112 = arith.constant 112 : index
    %c0_32 = arith.constant 0 : index
    %77 = vector.load %arg8[%c112, %c0_32] : memref<144x128xbf16, #tpu.memory_space<vmem>>, vector<16x128xbf16>
    tpu.vector_store %arg8[%c112, %c0_32], %76 {strides = array<i32>} : memref<144x128xbf16, #tpu.memory_space<vmem>>, vector<16x128xbf16>,
    %c0_33 = arith.constant 0 : index
    %c133 = arith.constant 133 : index
    %78 = vector.load %arg7[%c0_33, %c133] : memref<16x384xbf16, #tpu.memory_space<vmem>>, vector<16x128xbf16>
    %79 = vector.broadcast %42 : vector<1x128xbf16> to vector<16x128xbf16>
    %80 = arith.mulf %78, %79 : vector<16x128xbf16>
    %c128_34 = arith.constant 128 : index
    %c0_35 = arith.constant 0 : index
    %81 = vector.load %arg8[%c128_34, %c0_35] : memref<144x128xbf16, #tpu.memory_space<vmem>>, vector<16x128xbf16>
    tpu.vector_store %arg8[%c128_34, %c0_35], %80 {strides = array<i32>} : memref<144x128xbf16, #tpu.memory_space<vmem>>, vector<16x128xbf16>,
    %c0_36 = arith.constant 0 : index
    %c0_37 = arith.constant 0 : index
    %82 = vector.load %arg2[%c0_36, %c0_37] : memref<16x144xbf16, #tpu.memory_space<vmem>>, vector<16x144xbf16>
    %c0_38 = arith.constant 0 : index
    %c0_39 = arith.constant 0 : index
    %83 = vector.load %arg8[%c0_38, %c0_39] : memref<144x128xbf16, #tpu.memory_space<vmem>>, vector<144x128xbf16>
    %cst_40 = arith.constant dense<0.000000e+00> : vector<16x128xf32>
    %84 = tpu.matmul %82, %83, %cst_40 {dimension_numbers = #tpu.dot_dimension_numbers<[1], [0], [0], [1], [0, 0, 1, 1], [], []>} : vector<16x144xbf16>, vector<144x128xbf16>, vector<16x128xf32> -> vector<16x128xf32>
    %c0_41 = arith.constant 0 : index
    %c0_42 = arith.constant 0 : index
    %85 = vector.load %arg3[%c0_41, %c0_42] : memref<16x1xf32, #tpu.memory_space<vmem>>, vector<16x1xf32>
    %86 = vector.broadcast %85 : vector<16x1xf32> to vector<16x128xf32>
    %87 = arith.addf %84, %86 : vector<16x128xf32>
    %c0_43 = arith.constant 0 : index
    %c128_44 = arith.constant 128 : index
    %88 = vector.load %arg7[%c0_43, %c128_44] : memref<16x384xbf16, #tpu.memory_space<vmem>>, vector<16x128xbf16>
    %89 = arith.extf %88 : vector<16x128xbf16> to vector<16x128xf32>
    %90 = arith.addf %87, %89 : vector<16x128xf32>
    %cst_45 = arith.constant 0.000000e+00 : f32
    %91 = vector.broadcast %cst_45 : f32 to vector<16x128xf32>
    %92 = arith.maximumf %90, %91 : vector<16x128xf32>
    %93 = vector.broadcast %46 : vector<1x128xf32> to vector<16x128xf32>
    %94 = arith.mulf %92, %93 : vector<16x128xf32>
    %95 = arith.truncf %94 : vector<16x128xf32> to vector<16x128xbf16>
    %cst_46 = arith.constant 0.000000e+00 : bf16
    %96 = vector.broadcast %cst_46 : bf16 to vector<16x384xbf16>
    %c0_47 = arith.constant 0 : index
    %c0_48 = arith.constant 0 : index
    %97 = vector.load %arg9[%c0_47, %c0_48] : memref<16x384xbf16, #tpu.memory_space<vmem>>, vector<16x384xbf16>
    tpu.vector_store %arg9[%c0_47, %c0_48], %96 {strides = array<i32>} : memref<16x384xbf16, #tpu.memory_space<vmem>>, vector<16x384xbf16>,
    %c0_49 = arith.constant 0 : index
    %c128_50 = arith.constant 128 : index
    %98 = vector.load %arg9[%c0_49, %c128_50] : memref<16x384xbf16, #tpu.memory_space<vmem>>, vector<16x128xbf16>
    tpu.vector_store %arg9[%c0_49, %c128_50], %95 {strides = array<i32>} : memref<16x384xbf16, #tpu.memory_space<vmem>>, vector<16x128xbf16>,
    %c0_51 = arith.constant 0 : index
    %c123_52 = arith.constant 123 : index
    %99 = vector.load %arg9[%c0_51, %c123_52] : memref<16x384xbf16, #tpu.memory_space<vmem>>, vector<16x128xbf16>
    %100 = vector.broadcast %21 : vector<1x128xbf16> to vector<16x128xbf16>
    %101 = arith.mulf %99, %100 : vector<16x128xbf16>
    %c0_53 = arith.constant 0 : index
    %c0_54 = arith.constant 0 : index
    %102 = vector.load %arg10[%c0_53, %c0_54] : memref<144x128xbf16, #tpu.memory_space<vmem>>, vector<16x128xbf16>
    tpu.vector_store %arg10[%c0_53, %c0_54], %101 {strides = array<i32>} : memref<144x128xbf16, #tpu.memory_space<vmem>>, vector<16x128xbf16>,
    %c0_55 = arith.constant 0 : index
    %c124_56 = arith.constant 124 : index
    %103 = vector.load %arg9[%c0_55, %c124_56] : memref<16x384xbf16, #tpu.memory_space<vmem>>, vector<16x128xbf16>
    %c16_57 = arith.constant 16 : index
    %c0_58 = arith.constant 0 : index
    %104 = vector.load %arg10[%c16_57, %c0_58] : memref<144x128xbf16, #tpu.memory_space<vmem>>, vector<16x128xbf16>
    tpu.vector_store %arg10[%c16_57, %c0_58], %103 {strides = array<i32>} : memref<144x128xbf16, #tpu.memory_space<vmem>>, vector<16x128xbf16>,
    %c0_59 = arith.constant 0 : index
    %c125_60 = arith.constant 125 : index
    %105 = vector.load %arg9[%c0_59, %c125_60] : memref<16x384xbf16, #tpu.memory_space<vmem>>, vector<16x128xbf16>
    %106 = vector.broadcast %42 : vector<1x128xbf16> to vector<16x128xbf16>
    %107 = arith.mulf %105, %106 : vector<16x128xbf16>
    %c32_61 = arith.constant 32 : index
    %c0_62 = arith.constant 0 : index
    %108 = vector.load %arg10[%c32_61, %c0_62] : memref<144x128xbf16, #tpu.memory_space<vmem>>, vector<16x128xbf16>
    tpu.vector_store %arg10[%c32_61, %c0_62], %107 {strides = array<i32>} : memref<144x128xbf16, #tpu.memory_space<vmem>>, vector<16x128xbf16>,
    %c0_63 = arith.constant 0 : index
    %c127_64 = arith.constant 127 : index
    %109 = vector.load %arg9[%c0_63, %c127_64] : memref<16x384xbf16, #tpu.memory_space<vmem>>, vector<16x128xbf16>
    %110 = vector.broadcast %21 : vector<1x128xbf16> to vector<16x128xbf16>
    %111 = arith.mulf %109, %110 : vector<16x128xbf16>
    %c48_65 = arith.constant 48 : index
    %c0_66 = arith.constant 0 : index
    %112 = vector.load %arg10[%c48_65, %c0_66] : memref<144x128xbf16, #tpu.memory_space<vmem>>, vector<16x128xbf16>
    tpu.vector_store %arg10[%c48_65, %c0_66], %111 {strides = array<i32>} : memref<144x128xbf16, #tpu.memory_space<vmem>>, vector<16x128xbf16>,
    %c0_67 = arith.constant 0 : index
    %c128_68 = arith.constant 128 : index
    %113 = vector.load %arg9[%c0_67, %c128_68] : memref<16x384xbf16, #tpu.memory_space<vmem>>, vector<16x128xbf16>
    %c64_69 = arith.constant 64 : index
    %c0_70 = arith.constant 0 : index
    %114 = vector.load %arg10[%c64_69, %c0_70] : memref<144x128xbf16, #tpu.memory_space<vmem>>, vector<16x128xbf16>
    tpu.vector_store %arg10[%c64_69, %c0_70], %113 {strides = array<i32>} : memref<144x128xbf16, #tpu.memory_space<vmem>>, vector<16x128xbf16>,
    %c0_71 = arith.constant 0 : index
    %c129_72 = arith.constant 129 : index
    %115 = vector.load %arg9[%c0_71, %c129_72] : memref<16x384xbf16, #tpu.memory_space<vmem>>, vector<16x128xbf16>
    %116 = vector.broadcast %42 : vector<1x128xbf16> to vector<16x128xbf16>
    %117 = arith.mulf %115, %116 : vector<16x128xbf16>
    %c80_73 = arith.constant 80 : index
    %c0_74 = arith.constant 0 : index
    %118 = vector.load %arg10[%c80_73, %c0_74] : memref<144x128xbf16, #tpu.memory_space<vmem>>, vector<16x128xbf16>
    tpu.vector_store %arg10[%c80_73, %c0_74], %117 {strides = array<i32>} : memref<144x128xbf16, #tpu.memory_space<vmem>>, vector<16x128xbf16>,
    %c0_75 = arith.constant 0 : index
    %c131_76 = arith.constant 131 : index
    %119 = vector.load %arg9[%c0_75, %c131_76] : memref<16x384xbf16, #tpu.memory_space<vmem>>, vector<16x128xbf16>
    %120 = vector.broadcast %21 : vector<1x128xbf16> to vector<16x128xbf16>
    %121 = arith.mulf %119, %120 : vector<16x128xbf16>
    %c96_77 = arith.constant 96 : index
    %c0_78 = arith.constant 0 : index
    %122 = vector.load %arg10[%c96_77, %c0_78] : memref<144x128xbf16, #tpu.memory_space<vmem>>, vector<16x128xbf16>
    tpu.vector_store %arg10[%c96_77, %c0_78], %121 {strides = array<i32>} : memref<144x128xbf16, #tpu.memory_space<vmem>>, vector<16x128xbf16>,
    %c0_79 = arith.constant 0 : index
    %c132_80 = arith.constant 132 : index
    %123 = vector.load %arg9[%c0_79, %c132_80] : memref<16x384xbf16, #tpu.memory_space<vmem>>, vector<16x128xbf16>
    %c112_81 = arith.constant 112 : index
    %c0_82 = arith.constant 0 : index
    %124 = vector.load %arg10[%c112_81, %c0_82] : memref<144x128xbf16, #tpu.memory_space<vmem>>, vector<16x128xbf16>
    tpu.vector_store %arg10[%c112_81, %c0_82], %123 {strides = array<i32>} : memref<144x128xbf16, #tpu.memory_space<vmem>>, vector<16x128xbf16>,
    %c0_83 = arith.constant 0 : index
    %c133_84 = arith.constant 133 : index
    %125 = vector.load %arg9[%c0_83, %c133_84] : memref<16x384xbf16, #tpu.memory_space<vmem>>, vector<16x128xbf16>
    %126 = vector.broadcast %42 : vector<1x128xbf16> to vector<16x128xbf16>
    %127 = arith.mulf %125, %126 : vector<16x128xbf16>
    %c128_85 = arith.constant 128 : index
    %c0_86 = arith.constant 0 : index
    %128 = vector.load %arg10[%c128_85, %c0_86] : memref<144x128xbf16, #tpu.memory_space<vmem>>, vector<16x128xbf16>
    tpu.vector_store %arg10[%c128_85, %c0_86], %127 {strides = array<i32>} : memref<144x128xbf16, #tpu.memory_space<vmem>>, vector<16x128xbf16>,
    %c0_87 = arith.constant 0 : index
    %c0_88 = arith.constant 0 : index
    %129 = vector.load %arg4[%c0_87, %c0_88] : memref<16x144xbf16, #tpu.memory_space<vmem>>, vector<16x144xbf16>
    %c0_89 = arith.constant 0 : index
    %c0_90 = arith.constant 0 : index
    %130 = vector.load %arg10[%c0_89, %c0_90] : memref<144x128xbf16, #tpu.memory_space<vmem>>, vector<144x128xbf16>
    %cst_91 = arith.constant dense<0.000000e+00> : vector<16x128xf32>
    %131 = tpu.matmul %129, %130, %cst_91 {dimension_numbers = #tpu.dot_dimension_numbers<[1], [0], [0], [1], [0, 0, 1, 1], [], []>} : vector<16x144xbf16>, vector<144x128xbf16>, vector<16x128xf32> -> vector<16x128xf32>
    %c0_92 = arith.constant 0 : index
    %c0_93 = arith.constant 0 : index
    %132 = vector.load %arg5[%c0_92, %c0_93] : memref<16x1xf32, #tpu.memory_space<vmem>>, vector<16x1xf32>
    %133 = vector.broadcast %132 : vector<16x1xf32> to vector<16x128xf32>
    %134 = arith.addf %131, %133 : vector<16x128xf32>
    %cst_94 = arith.constant 0.000000e+00 : f32
    %135 = vector.broadcast %cst_94 : f32 to vector<16x128xf32>
    %136 = arith.maximumf %134, %135 : vector<16x128xf32>
    %137 = arith.truncf %136 : vector<16x128xf32> to vector<16x128xbf16>
    %c0_95 = arith.constant 0 : index
    %c0_96 = arith.constant 0 : index
    %c0_97 = arith.constant 0 : index
    %138 = vector.load %arg6[%c0_95, %c0_96, %c0_97] : memref<1x16x128xbf16, #tpu.memory_space<vmem>>, vector<1x16x128xbf16>
    %139 = vector.shape_cast %138 : vector<1x16x128xbf16> to vector<16x128xbf16>
    %140 = vector.shape_cast %137 : vector<16x128xbf16> to vector<1x16x128xbf16>
    tpu.vector_store %arg6[%c0_95, %c0_96, %c0_97], %140 {strides = array<i32>} : memref<1x16x128xbf16, #tpu.memory_space<vmem>>, vector<1x16x128xbf16>,
    return
  }
  func.func @transform_0(%arg0: i32) -> (i32, i32, i32) {
    %c0_i32 = arith.constant 0 : i32
    %c0_i32_0 = arith.constant 0 : i32
    %c0_i32_1 = arith.constant 0 : i32
    return %arg0, %c0_i32, %c0_i32_0 : i32, i32, i32
  }
  func.func @transform_1(%arg0: i32) -> (i32, i32) {
    %c0_i32 = arith.constant 0 : i32
    %c0_i32_0 = arith.constant 0 : i32
    %c0_i32_1 = arith.constant 0 : i32
    return %c0_i32, %c0_i32_0 : i32, i32
  }
  func.func @transform_2(%arg0: i32) -> (i32, i32) {
    %c0_i32 = arith.constant 0 : i32
    %c0_i32_0 = arith.constant 0 : i32
    %c0_i32_1 = arith.constant 0 : i32
    return %c0_i32, %c0_i32_0 : i32, i32
  }
  func.func @transform_3(%arg0: i32) -> (i32, i32) {
    %c0_i32 = arith.constant 0 : i32
    %c0_i32_0 = arith.constant 0 : i32
    %c0_i32_1 = arith.constant 0 : i32
    return %c0_i32, %c0_i32_0 : i32, i32
  }
  func.func @transform_4(%arg0: i32) -> (i32, i32) {
    %c0_i32 = arith.constant 0 : i32
    %c0_i32_0 = arith.constant 0 : i32
    %c0_i32_1 = arith.constant 0 : i32
    return %c0_i32, %c0_i32_0 : i32, i32
  }
  func.func @transform_5(%arg0: i32) -> (i32, i32, i32) {
    %c0_i32 = arith.constant 0 : i32
    %c0_i32_0 = arith.constant 0 : i32
    %c0_i32_1 = arith.constant 0 : i32
    return %arg0, %c0_i32, %c0_i32_0 : i32, i32, i32
  }
}

module attributes {stable_mosaic.version = 11 : i64} {
  func.func @kernel(%arg0: i32, %arg1: memref<1x16x4xbf16, #tpu.memory_space<vmem>>, %arg2: memref<32x144xbf16, #tpu.memory_space<vmem>>, %arg3: memref<32x1xf32, #tpu.memory_space<vmem>>, %arg4: memref<32x288xbf16, #tpu.memory_space<vmem>>, %arg5: memref<32x1xf32, #tpu.memory_space<vmem>>, %arg6: memref<1x32x128xbf16, #tpu.memory_space<vmem>>, %arg7: memref<16x384xbf16, #tpu.memory_space<vmem>>, %arg8: memref<144x128xbf16, #tpu.memory_space<vmem>>, %arg9: memref<32x384xbf16, #tpu.memory_space<vmem>>, %arg10: memref<288x128xbf16, #tpu.memory_space<vmem>>) attributes {dimension_semantics = [#tpu.dimension_semantics<parallel>], iteration_bounds = array<i64: 2>, scalar_prefetch = 0 : i64, scratch_operands = 4 : i64, tpu.core_type = #tpu.core_type<tc>, window_params = [{transform_indices = @transform_0, window_bounds = array<i64: 1, 16, 4>}, {pipeline_mode = #tpu.pipeline_mode<synchronous>, transform_indices = @transform_1, window_bounds = array<i64: 32, 144>}, {pipeline_mode = #tpu.pipeline_mode<synchronous>, transform_indices = @transform_2, window_bounds = array<i64: 32, 1>}, {pipeline_mode = #tpu.pipeline_mode<synchronous>, transform_indices = @transform_3, window_bounds = array<i64: 32, 288>}, {pipeline_mode = #tpu.pipeline_mode<synchronous>, transform_indices = @transform_4, window_bounds = array<i64: 32, 1>}, {transform_indices = @transform_5, window_bounds = array<i64: 1, 32, 128>}]} {
    %0 = tpu.iota {dimensions = array<i32: 1>} : vector<1x128xi32>
    %c2_i32 = arith.constant 2 : i32
    %c0_i32 = arith.constant 0 : i32
    %1 = arith.cmpi eq, %c2_i32, %c0_i32 : i32
    %c1_i32 = arith.constant 1 : i32
    %2 = arith.select %1, %c1_i32, %c2_i32 : i32
    %3 = vector.broadcast %2 : i32 to vector<1x128xi32>
    %4 = arith.remsi %0, %3 : vector<1x128xi32>
    %c0_i32_0 = arith.constant 0 : i32
    %5 = vector.broadcast %c0_i32_0 : i32 to vector<1x128xi32>
    %6 = arith.cmpi ne, %4, %5 : vector<1x128xi32>
    %c0_i32_1 = arith.constant 0 : i32
    %7 = vector.broadcast %c0_i32_1 : i32 to vector<1x128xi32>
    %8 = arith.cmpi slt, %4, %7 : vector<1x128xi32>
    %c0_i32_2 = arith.constant 0 : i32
    %9 = arith.cmpi slt, %2, %c0_i32_2 : i32
    %10 = vector.broadcast %9 : i1 to vector<1x128xi1>
    %11 = vector.broadcast %10 : vector<1x128xi1> to vector<1x128xi1>
    %12 = arith.xori %8, %11 : vector<1x128xi1>
    %13 = arith.andi %12, %6 : vector<1x128xi1>
    %14 = vector.broadcast %2 : i32 to vector<1x128xi32>
    %15 = arith.addi %4, %14 : vector<1x128xi32>
    %16 = arith.select %13, %15, %4 : vector<1x128xi1>, vector<1x128xi32>
    %c0_i32_3 = arith.constant 0 : i32
    %17 = vector.broadcast %c0_i32_3 : i32 to vector<1x128xi32>
    %18 = arith.cmpi ne, %16, %17 : vector<1x128xi32>
    %19 = arith.extui %18 : vector<1x128xi1> to vector<1x128xi32>
    %20 = arith.sitofp %19 : vector<1x128xi32> to vector<1x128xf32>
    %21 = arith.truncf %20 : vector<1x128xf32> to vector<1x128xbf16>
    %c2_i32_4 = arith.constant 2 : i32
    %c0_i32_5 = arith.constant 0 : i32
    %22 = arith.cmpi eq, %c2_i32_4, %c0_i32_5 : i32
    %c1_i32_6 = arith.constant 1 : i32
    %23 = arith.select %22, %c1_i32_6, %c2_i32_4 : i32
    %24 = vector.broadcast %23 : i32 to vector<1x128xi32>
    %25 = arith.remsi %0, %24 : vector<1x128xi32>
    %c0_i32_7 = arith.constant 0 : i32
    %26 = vector.broadcast %c0_i32_7 : i32 to vector<1x128xi32>
    %27 = arith.cmpi ne, %25, %26 : vector<1x128xi32>
    %c0_i32_8 = arith.constant 0 : i32
    %28 = vector.broadcast %c0_i32_8 : i32 to vector<1x128xi32>
    %29 = arith.cmpi slt, %25, %28 : vector<1x128xi32>
    %c0_i32_9 = arith.constant 0 : i32
    %30 = arith.cmpi slt, %23, %c0_i32_9 : i32
    %31 = vector.broadcast %30 : i1 to vector<1x128xi1>
    %32 = vector.broadcast %31 : vector<1x128xi1> to vector<1x128xi1>
    %33 = arith.xori %29, %32 : vector<1x128xi1>
    %34 = arith.andi %33, %27 : vector<1x128xi1>
    %35 = vector.broadcast %23 : i32 to vector<1x128xi32>
    %36 = arith.addi %25, %35 : vector<1x128xi32>
    %37 = arith.select %34, %36, %25 : vector<1x128xi1>, vector<1x128xi32>
    %c1_i32_10 = arith.constant 1 : i32
    %38 = vector.broadcast %c1_i32_10 : i32 to vector<1x128xi32>
    %39 = arith.cmpi ne, %37, %38 : vector<1x128xi32>
    %40 = arith.extui %39 : vector<1x128xi1> to vector<1x128xi32>
    %41 = arith.sitofp %40 : vector<1x128xi32> to vector<1x128xf32>
    %42 = arith.truncf %41 : vector<1x128xf32> to vector<1x128xbf16>
    %c4_i32 = arith.constant 4 : i32
    %43 = vector.broadcast %c4_i32 : i32 to vector<1x128xi32>
    %44 = arith.cmpi slt, %0, %43 : vector<1x128xi32>
    %45 = arith.extui %44 : vector<1x128xi1> to vector<1x128xi32>
    %46 = arith.sitofp %45 : vector<1x128xi32> to vector<1x128xf32>
    %cst = arith.constant 0.000000e+00 : bf16
    %47 = vector.broadcast %cst : bf16 to vector<16x384xbf16>
    %c0 = arith.constant 0 : index
    %c0_11 = arith.constant 0 : index
    %48 = vector.load %arg7[%c0, %c0_11] : memref<16x384xbf16, #tpu.memory_space<vmem>>, vector<16x384xbf16>
    tpu.vector_store %arg7[%c0, %c0_11], %47 {strides = array<i32>} : memref<16x384xbf16, #tpu.memory_space<vmem>>, vector<16x384xbf16>,
    %c0_12 = arith.constant 0 : index
    %c0_13 = arith.constant 0 : index
    %c0_14 = arith.constant 0 : index
    %49 = vector.load %arg1[%c0_12, %c0_13, %c0_14] : memref<1x16x4xbf16, #tpu.memory_space<vmem>>, vector<1x16x4xbf16>
    %50 = vector.shape_cast %49 : vector<1x16x4xbf16> to vector<16x4xbf16>
    %c0_15 = arith.constant 0 : index
    %c128 = arith.constant 128 : index
    %51 = vector.load %arg7[%c0_15, %c128] : memref<16x384xbf16, #tpu.memory_space<vmem>>, vector<16x4xbf16>
    tpu.vector_store %arg7[%c0_15, %c128], %50 {strides = array<i32>} : memref<16x384xbf16, #tpu.memory_space<vmem>>, vector<16x4xbf16>,
    %c0_16 = arith.constant 0 : index
    %c125 = arith.constant 125 : index
    %52 = vector.load %arg7[%c0_16, %c125] : memref<16x384xbf16, #tpu.memory_space<vmem>>, vector<16x128xbf16>
    %53 = vector.broadcast %21 : vector<1x128xbf16> to vector<16x128xbf16>
    %54 = arith.mulf %52, %53 : vector<16x128xbf16>
    %c0_17 = arith.constant 0 : index
    %c0_18 = arith.constant 0 : index
    %55 = vector.load %arg8[%c0_17, %c0_18] : memref<144x128xbf16, #tpu.memory_space<vmem>>, vector<16x128xbf16>
    tpu.vector_store %arg8[%c0_17, %c0_18], %54 {strides = array<i32>} : memref<144x128xbf16, #tpu.memory_space<vmem>>, vector<16x128xbf16>,
    %c0_19 = arith.constant 0 : index
    %c126 = arith.constant 126 : index
    %56 = vector.load %arg7[%c0_19, %c126] : memref<16x384xbf16, #tpu.memory_space<vmem>>, vector<16x128xbf16>
    %c16 = arith.constant 16 : index
    %c0_20 = arith.constant 0 : index
    %57 = vector.load %arg8[%c16, %c0_20] : memref<144x128xbf16, #tpu.memory_space<vmem>>, vector<16x128xbf16>
    tpu.vector_store %arg8[%c16, %c0_20], %56 {strides = array<i32>} : memref<144x128xbf16, #tpu.memory_space<vmem>>, vector<16x128xbf16>,
    %c0_21 = arith.constant 0 : index
    %c127 = arith.constant 127 : index
    %58 = vector.load %arg7[%c0_21, %c127] : memref<16x384xbf16, #tpu.memory_space<vmem>>, vector<16x128xbf16>
    %59 = vector.broadcast %42 : vector<1x128xbf16> to vector<16x128xbf16>
    %60 = arith.mulf %58, %59 : vector<16x128xbf16>
    %c32 = arith.constant 32 : index
    %c0_22 = arith.constant 0 : index
    %61 = vector.load %arg8[%c32, %c0_22] : memref<144x128xbf16, #tpu.memory_space<vmem>>, vector<16x128xbf16>
    tpu.vector_store %arg8[%c32, %c0_22], %60 {strides = array<i32>} : memref<144x128xbf16, #tpu.memory_space<vmem>>, vector<16x128xbf16>,
    %c0_23 = arith.constant 0 : index
    %c127_24 = arith.constant 127 : index
    %62 = vector.load %arg7[%c0_23, %c127_24] : memref<16x384xbf16, #tpu.memory_space<vmem>>, vector<16x128xbf16>
    %63 = vector.broadcast %21 : vector<1x128xbf16> to vector<16x128xbf16>
    %64 = arith.mulf %62, %63 : vector<16x128xbf16>
    %c48 = arith.constant 48 : index
    %c0_25 = arith.constant 0 : index
    %65 = vector.load %arg8[%c48, %c0_25] : memref<144x128xbf16, #tpu.memory_space<vmem>>, vector<16x128xbf16>
    tpu.vector_store %arg8[%c48, %c0_25], %64 {strides = array<i32>} : memref<144x128xbf16, #tpu.memory_space<vmem>>, vector<16x128xbf16>,
    %c0_26 = arith.constant 0 : index
    %c128_27 = arith.constant 128 : index
    %66 = vector.load %arg7[%c0_26, %c128_27] : memref<16x384xbf16, #tpu.memory_space<vmem>>, vector<16x128xbf16>
    %c64 = arith.constant 64 : index
    %c0_28 = arith.constant 0 : index
    %67 = vector.load %arg8[%c64, %c0_28] : memref<144x128xbf16, #tpu.memory_space<vmem>>, vector<16x128xbf16>
    tpu.vector_store %arg8[%c64, %c0_28], %66 {strides = array<i32>} : memref<144x128xbf16, #tpu.memory_space<vmem>>, vector<16x128xbf16>,
    %c0_29 = arith.constant 0 : index
    %c129 = arith.constant 129 : index
    %68 = vector.load %arg7[%c0_29, %c129] : memref<16x384xbf16, #tpu.memory_space<vmem>>, vector<16x128xbf16>
    %69 = vector.broadcast %42 : vector<1x128xbf16> to vector<16x128xbf16>
    %70 = arith.mulf %68, %69 : vector<16x128xbf16>
    %c80 = arith.constant 80 : index
    %c0_30 = arith.constant 0 : index
    %71 = vector.load %arg8[%c80, %c0_30] : memref<144x128xbf16, #tpu.memory_space<vmem>>, vector<16x128xbf16>
    tpu.vector_store %arg8[%c80, %c0_30], %70 {strides = array<i32>} : memref<144x128xbf16, #tpu.memory_space<vmem>>, vector<16x128xbf16>,
    %c0_31 = arith.constant 0 : index
    %c129_32 = arith.constant 129 : index
    %72 = vector.load %arg7[%c0_31, %c129_32] : memref<16x384xbf16, #tpu.memory_space<vmem>>, vector<16x128xbf16>
    %73 = vector.broadcast %21 : vector<1x128xbf16> to vector<16x128xbf16>
    %74 = arith.mulf %72, %73 : vector<16x128xbf16>
    %c96 = arith.constant 96 : index
    %c0_33 = arith.constant 0 : index
    %75 = vector.load %arg8[%c96, %c0_33] : memref<144x128xbf16, #tpu.memory_space<vmem>>, vector<16x128xbf16>
    tpu.vector_store %arg8[%c96, %c0_33], %74 {strides = array<i32>} : memref<144x128xbf16, #tpu.memory_space<vmem>>, vector<16x128xbf16>,
    %c0_34 = arith.constant 0 : index
    %c130 = arith.constant 130 : index
    %76 = vector.load %arg7[%c0_34, %c130] : memref<16x384xbf16, #tpu.memory_space<vmem>>, vector<16x128xbf16>
    %c112 = arith.constant 112 : index
    %c0_35 = arith.constant 0 : index
    %77 = vector.load %arg8[%c112, %c0_35] : memref<144x128xbf16, #tpu.memory_space<vmem>>, vector<16x128xbf16>
    tpu.vector_store %arg8[%c112, %c0_35], %76 {strides = array<i32>} : memref<144x128xbf16, #tpu.memory_space<vmem>>, vector<16x128xbf16>,
    %c0_36 = arith.constant 0 : index
    %c131 = arith.constant 131 : index
    %78 = vector.load %arg7[%c0_36, %c131] : memref<16x384xbf16, #tpu.memory_space<vmem>>, vector<16x128xbf16>
    %79 = vector.broadcast %42 : vector<1x128xbf16> to vector<16x128xbf16>
    %80 = arith.mulf %78, %79 : vector<16x128xbf16>
    %c128_37 = arith.constant 128 : index
    %c0_38 = arith.constant 0 : index
    %81 = vector.load %arg8[%c128_37, %c0_38] : memref<144x128xbf16, #tpu.memory_space<vmem>>, vector<16x128xbf16>
    tpu.vector_store %arg8[%c128_37, %c0_38], %80 {strides = array<i32>} : memref<144x128xbf16, #tpu.memory_space<vmem>>, vector<16x128xbf16>,
    %c0_39 = arith.constant 0 : index
    %c0_40 = arith.constant 0 : index
    %82 = vector.load %arg2[%c0_39, %c0_40] : memref<32x144xbf16, #tpu.memory_space<vmem>>, vector<32x144xbf16>
    %c0_41 = arith.constant 0 : index
    %c0_42 = arith.constant 0 : index
    %83 = vector.load %arg8[%c0_41, %c0_42] : memref<144x128xbf16, #tpu.memory_space<vmem>>, vector<144x128xbf16>
    %cst_43 = arith.constant dense<0.000000e+00> : vector<32x128xf32>
    %84 = tpu.matmul %82, %83, %cst_43 {dimension_numbers = #tpu.dot_dimension_numbers<[1], [0], [0], [1], [0, 0, 1, 1], [], []>} : vector<32x144xbf16>, vector<144x128xbf16>, vector<32x128xf32> -> vector<32x128xf32>
    %c0_44 = arith.constant 0 : index
    %c0_45 = arith.constant 0 : index
    %85 = vector.load %arg3[%c0_44, %c0_45] : memref<32x1xf32, #tpu.memory_space<vmem>>, vector<32x1xf32>
    %86 = vector.broadcast %85 : vector<32x1xf32> to vector<32x128xf32>
    %87 = arith.addf %84, %86 : vector<32x128xf32>
    %cst_46 = arith.constant 0.000000e+00 : f32
    %88 = vector.broadcast %cst_46 : f32 to vector<32x128xf32>
    %89 = arith.maximumf %87, %88 : vector<32x128xf32>
    %90 = vector.broadcast %46 : vector<1x128xf32> to vector<32x128xf32>
    %91 = arith.mulf %89, %90 : vector<32x128xf32>
    %92 = arith.truncf %91 : vector<32x128xf32> to vector<32x128xbf16>
    %cst_47 = arith.constant 0.000000e+00 : bf16
    %93 = vector.broadcast %cst_47 : bf16 to vector<32x384xbf16>
    %c0_48 = arith.constant 0 : index
    %c0_49 = arith.constant 0 : index
    %94 = vector.load %arg9[%c0_48, %c0_49] : memref<32x384xbf16, #tpu.memory_space<vmem>>, vector<32x384xbf16>
    tpu.vector_store %arg9[%c0_48, %c0_49], %93 {strides = array<i32>} : memref<32x384xbf16, #tpu.memory_space<vmem>>, vector<32x384xbf16>,
    %c0_50 = arith.constant 0 : index
    %c128_51 = arith.constant 128 : index
    %95 = vector.load %arg9[%c0_50, %c128_51] : memref<32x384xbf16, #tpu.memory_space<vmem>>, vector<32x128xbf16>
    tpu.vector_store %arg9[%c0_50, %c128_51], %92 {strides = array<i32>} : memref<32x384xbf16, #tpu.memory_space<vmem>>, vector<32x128xbf16>,
    %c0_52 = arith.constant 0 : index
    %c125_53 = arith.constant 125 : index
    %96 = vector.load %arg9[%c0_52, %c125_53] : memref<32x384xbf16, #tpu.memory_space<vmem>>, vector<32x128xbf16>
    %97 = vector.broadcast %21 : vector<1x128xbf16> to vector<32x128xbf16>
    %98 = arith.mulf %96, %97 : vector<32x128xbf16>
    %c0_54 = arith.constant 0 : index
    %c0_55 = arith.constant 0 : index
    %99 = vector.load %arg10[%c0_54, %c0_55] : memref<288x128xbf16, #tpu.memory_space<vmem>>, vector<32x128xbf16>
    tpu.vector_store %arg10[%c0_54, %c0_55], %98 {strides = array<i32>} : memref<288x128xbf16, #tpu.memory_space<vmem>>, vector<32x128xbf16>,
    %c0_56 = arith.constant 0 : index
    %c126_57 = arith.constant 126 : index
    %100 = vector.load %arg9[%c0_56, %c126_57] : memref<32x384xbf16, #tpu.memory_space<vmem>>, vector<32x128xbf16>
    %c32_58 = arith.constant 32 : index
    %c0_59 = arith.constant 0 : index
    %101 = vector.load %arg10[%c32_58, %c0_59] : memref<288x128xbf16, #tpu.memory_space<vmem>>, vector<32x128xbf16>
    tpu.vector_store %arg10[%c32_58, %c0_59], %100 {strides = array<i32>} : memref<288x128xbf16, #tpu.memory_space<vmem>>, vector<32x128xbf16>,
    %c0_60 = arith.constant 0 : index
    %c127_61 = arith.constant 127 : index
    %102 = vector.load %arg9[%c0_60, %c127_61] : memref<32x384xbf16, #tpu.memory_space<vmem>>, vector<32x128xbf16>
    %103 = vector.broadcast %42 : vector<1x128xbf16> to vector<32x128xbf16>
    %104 = arith.mulf %102, %103 : vector<32x128xbf16>
    %c64_62 = arith.constant 64 : index
    %c0_63 = arith.constant 0 : index
    %105 = vector.load %arg10[%c64_62, %c0_63] : memref<288x128xbf16, #tpu.memory_space<vmem>>, vector<32x128xbf16>
    tpu.vector_store %arg10[%c64_62, %c0_63], %104 {strides = array<i32>} : memref<288x128xbf16, #tpu.memory_space<vmem>>, vector<32x128xbf16>,
    %c0_64 = arith.constant 0 : index
    %c127_65 = arith.constant 127 : index
    %106 = vector.load %arg9[%c0_64, %c127_65] : memref<32x384xbf16, #tpu.memory_space<vmem>>, vector<32x128xbf16>
    %107 = vector.broadcast %21 : vector<1x128xbf16> to vector<32x128xbf16>
    %108 = arith.mulf %106, %107 : vector<32x128xbf16>
    %c96_66 = arith.constant 96 : index
    %c0_67 = arith.constant 0 : index
    %109 = vector.load %arg10[%c96_66, %c0_67] : memref<288x128xbf16, #tpu.memory_space<vmem>>, vector<32x128xbf16>
    tpu.vector_store %arg10[%c96_66, %c0_67], %108 {strides = array<i32>} : memref<288x128xbf16, #tpu.memory_space<vmem>>, vector<32x128xbf16>,
    %c0_68 = arith.constant 0 : index
    %c128_69 = arith.constant 128 : index
    %110 = vector.load %arg9[%c0_68, %c128_69] : memref<32x384xbf16, #tpu.memory_space<vmem>>, vector<32x128xbf16>
    %c128_70 = arith.constant 128 : index
    %c0_71 = arith.constant 0 : index
    %111 = vector.load %arg10[%c128_70, %c0_71] : memref<288x128xbf16, #tpu.memory_space<vmem>>, vector<32x128xbf16>
    tpu.vector_store %arg10[%c128_70, %c0_71], %110 {strides = array<i32>} : memref<288x128xbf16, #tpu.memory_space<vmem>>, vector<32x128xbf16>,
    %c0_72 = arith.constant 0 : index
    %c129_73 = arith.constant 129 : index
    %112 = vector.load %arg9[%c0_72, %c129_73] : memref<32x384xbf16, #tpu.memory_space<vmem>>, vector<32x128xbf16>
    %113 = vector.broadcast %42 : vector<1x128xbf16> to vector<32x128xbf16>
    %114 = arith.mulf %112, %113 : vector<32x128xbf16>
    %c160 = arith.constant 160 : index
    %c0_74 = arith.constant 0 : index
    %115 = vector.load %arg10[%c160, %c0_74] : memref<288x128xbf16, #tpu.memory_space<vmem>>, vector<32x128xbf16>
    tpu.vector_store %arg10[%c160, %c0_74], %114 {strides = array<i32>} : memref<288x128xbf16, #tpu.memory_space<vmem>>, vector<32x128xbf16>,
    %c0_75 = arith.constant 0 : index
    %c129_76 = arith.constant 129 : index
    %116 = vector.load %arg9[%c0_75, %c129_76] : memref<32x384xbf16, #tpu.memory_space<vmem>>, vector<32x128xbf16>
    %117 = vector.broadcast %21 : vector<1x128xbf16> to vector<32x128xbf16>
    %118 = arith.mulf %116, %117 : vector<32x128xbf16>
    %c192 = arith.constant 192 : index
    %c0_77 = arith.constant 0 : index
    %119 = vector.load %arg10[%c192, %c0_77] : memref<288x128xbf16, #tpu.memory_space<vmem>>, vector<32x128xbf16>
    tpu.vector_store %arg10[%c192, %c0_77], %118 {strides = array<i32>} : memref<288x128xbf16, #tpu.memory_space<vmem>>, vector<32x128xbf16>,
    %c0_78 = arith.constant 0 : index
    %c130_79 = arith.constant 130 : index
    %120 = vector.load %arg9[%c0_78, %c130_79] : memref<32x384xbf16, #tpu.memory_space<vmem>>, vector<32x128xbf16>
    %c224 = arith.constant 224 : index
    %c0_80 = arith.constant 0 : index
    %121 = vector.load %arg10[%c224, %c0_80] : memref<288x128xbf16, #tpu.memory_space<vmem>>, vector<32x128xbf16>
    tpu.vector_store %arg10[%c224, %c0_80], %120 {strides = array<i32>} : memref<288x128xbf16, #tpu.memory_space<vmem>>, vector<32x128xbf16>,
    %c0_81 = arith.constant 0 : index
    %c131_82 = arith.constant 131 : index
    %122 = vector.load %arg9[%c0_81, %c131_82] : memref<32x384xbf16, #tpu.memory_space<vmem>>, vector<32x128xbf16>
    %123 = vector.broadcast %42 : vector<1x128xbf16> to vector<32x128xbf16>
    %124 = arith.mulf %122, %123 : vector<32x128xbf16>
    %c256 = arith.constant 256 : index
    %c0_83 = arith.constant 0 : index
    %125 = vector.load %arg10[%c256, %c0_83] : memref<288x128xbf16, #tpu.memory_space<vmem>>, vector<32x128xbf16>
    tpu.vector_store %arg10[%c256, %c0_83], %124 {strides = array<i32>} : memref<288x128xbf16, #tpu.memory_space<vmem>>, vector<32x128xbf16>,
    %c0_84 = arith.constant 0 : index
    %c0_85 = arith.constant 0 : index
    %126 = vector.load %arg4[%c0_84, %c0_85] : memref<32x288xbf16, #tpu.memory_space<vmem>>, vector<32x288xbf16>
    %c0_86 = arith.constant 0 : index
    %c0_87 = arith.constant 0 : index
    %127 = vector.load %arg10[%c0_86, %c0_87] : memref<288x128xbf16, #tpu.memory_space<vmem>>, vector<288x128xbf16>
    %cst_88 = arith.constant dense<0.000000e+00> : vector<32x128xf32>
    %128 = tpu.matmul %126, %127, %cst_88 {dimension_numbers = #tpu.dot_dimension_numbers<[1], [0], [0], [1], [0, 0, 1, 1], [], []>} : vector<32x288xbf16>, vector<288x128xbf16>, vector<32x128xf32> -> vector<32x128xf32>
    %c0_89 = arith.constant 0 : index
    %c0_90 = arith.constant 0 : index
    %129 = vector.load %arg5[%c0_89, %c0_90] : memref<32x1xf32, #tpu.memory_space<vmem>>, vector<32x1xf32>
    %130 = vector.broadcast %129 : vector<32x1xf32> to vector<32x128xf32>
    %131 = arith.addf %128, %130 : vector<32x128xf32>
    %cst_91 = arith.constant 0.000000e+00 : f32
    %132 = vector.broadcast %cst_91 : f32 to vector<32x128xf32>
    %133 = arith.maximumf %131, %132 : vector<32x128xf32>
    %134 = arith.truncf %133 : vector<32x128xf32> to vector<32x128xbf16>
    %c0_92 = arith.constant 0 : index
    %c0_93 = arith.constant 0 : index
    %c0_94 = arith.constant 0 : index
    %135 = vector.load %arg6[%c0_92, %c0_93, %c0_94] : memref<1x32x128xbf16, #tpu.memory_space<vmem>>, vector<1x32x128xbf16>
    %136 = vector.shape_cast %135 : vector<1x32x128xbf16> to vector<32x128xbf16>
    %137 = vector.shape_cast %134 : vector<32x128xbf16> to vector<1x32x128xbf16>
    tpu.vector_store %arg6[%c0_92, %c0_93, %c0_94], %137 {strides = array<i32>} : memref<1x32x128xbf16, #tpu.memory_space<vmem>>, vector<1x32x128xbf16>,
    return
  }
  func.func @transform_0(%arg0: i32) -> (i32, i32, i32) {
    %c0_i32 = arith.constant 0 : i32
    %c0_i32_0 = arith.constant 0 : i32
    %c0_i32_1 = arith.constant 0 : i32
    return %arg0, %c0_i32, %c0_i32_0 : i32, i32, i32
  }
  func.func @transform_1(%arg0: i32) -> (i32, i32) {
    %c0_i32 = arith.constant 0 : i32
    %c0_i32_0 = arith.constant 0 : i32
    %c0_i32_1 = arith.constant 0 : i32
    return %c0_i32, %c0_i32_0 : i32, i32
  }
  func.func @transform_2(%arg0: i32) -> (i32, i32) {
    %c0_i32 = arith.constant 0 : i32
    %c0_i32_0 = arith.constant 0 : i32
    %c0_i32_1 = arith.constant 0 : i32
    return %c0_i32, %c0_i32_0 : i32, i32
  }
  func.func @transform_3(%arg0: i32) -> (i32, i32) {
    %c0_i32 = arith.constant 0 : i32
    %c0_i32_0 = arith.constant 0 : i32
    %c0_i32_1 = arith.constant 0 : i32
    return %c0_i32, %c0_i32_0 : i32, i32
  }
  func.func @transform_4(%arg0: i32) -> (i32, i32) {
    %c0_i32 = arith.constant 0 : i32
    %c0_i32_0 = arith.constant 0 : i32
    %c0_i32_1 = arith.constant 0 : i32
    return %c0_i32, %c0_i32_0 : i32, i32
  }
  func.func @transform_5(%arg0: i32) -> (i32, i32, i32) {
    %c0_i32 = arith.constant 0 : i32
    %c0_i32_0 = arith.constant 0 : i32
    %c0_i32_1 = arith.constant 0 : i32
    return %arg0, %c0_i32, %c0_i32_0 : i32, i32, i32
  }
}

module attributes {stable_mosaic.version = 11 : i64} {
  func.func @kernel(%arg0: i32, %arg1: memref<1x20x128xf32, #tpu.memory_space<vmem>>, %arg2: memref<1x4x16x128xbf16, #tpu.memory_space<vmem>>, %arg3: memref<1x4x16x128xbf16, #tpu.memory_space<vmem>>, %arg4: memref<1x4x32x128xbf16, #tpu.memory_space<vmem>>, %arg5: memref<1x64x128xf32, #tpu.memory_space<vmem>>) attributes {dimension_semantics = [#tpu.dimension_semantics<parallel>], iteration_bounds = array<i64: 2>, scalar_prefetch = 0 : i64, scratch_operands = 0 : i64, tpu.core_type = #tpu.core_type<tc>, window_params = [{transform_indices = @transform_0, window_bounds = array<i64: 1, 20, 128>}, {transform_indices = @transform_1, window_bounds = array<i64: 1, 4, 16, 128>}, {transform_indices = @transform_2, window_bounds = array<i64: 1, 4, 16, 128>}, {transform_indices = @transform_3, window_bounds = array<i64: 1, 4, 32, 128>}, {transform_indices = @transform_4, window_bounds = array<i64: 1, 64, 128>}]} {
    %c0 = arith.constant 0 : index
    %c0_0 = arith.constant 0 : index
    %c0_1 = arith.constant 0 : index
    %0 = vector.load %arg1[%c0, %c0_0, %c0_1] : memref<1x20x128xf32, #tpu.memory_space<vmem>>, vector<1x20x128xf32>
    %1 = vector.shape_cast %0 : vector<1x20x128xf32> to vector<20x128xf32>
    %2 = vector.extract_strided_slice %1 {offsets = [0, 0], sizes = [1, 128], strides = [1, 1]} : vector<20x128xf32> to vector<1x128xf32>
    %3 = vector.extract_strided_slice %1 {offsets = [4, 0], sizes = [1, 128], strides = [1, 1]} : vector<20x128xf32> to vector<1x128xf32>
    %4 = arith.mulf %2, %3 : vector<1x128xf32>
    %5 = vector.extract_strided_slice %1 {offsets = [1, 0], sizes = [1, 128], strides = [1, 1]} : vector<20x128xf32> to vector<1x128xf32>
    %6 = vector.extract_strided_slice %1 {offsets = [5, 0], sizes = [1, 128], strides = [1, 1]} : vector<20x128xf32> to vector<1x128xf32>
    %7 = arith.mulf %5, %6 : vector<1x128xf32>
    %8 = arith.addf %4, %7 : vector<1x128xf32>
    %9 = vector.extract_strided_slice %1 {offsets = [2, 0], sizes = [1, 128], strides = [1, 1]} : vector<20x128xf32> to vector<1x128xf32>
    %10 = vector.extract_strided_slice %1 {offsets = [6, 0], sizes = [1, 128], strides = [1, 1]} : vector<20x128xf32> to vector<1x128xf32>
    %11 = arith.mulf %9, %10 : vector<1x128xf32>
    %12 = arith.addf %8, %11 : vector<1x128xf32>
    %13 = vector.extract_strided_slice %1 {offsets = [3, 0], sizes = [1, 128], strides = [1, 1]} : vector<20x128xf32> to vector<1x128xf32>
    %14 = vector.extract_strided_slice %1 {offsets = [7, 0], sizes = [1, 128], strides = [1, 1]} : vector<20x128xf32> to vector<1x128xf32>
    %15 = arith.mulf %13, %14 : vector<1x128xf32>
    %16 = arith.addf %12, %15 : vector<1x128xf32>
    %c0_2 = arith.constant 0 : index
    %c0_3 = arith.constant 0 : index
    %c0_4 = arith.constant 0 : index
    %c0_5 = arith.constant 0 : index
    %17 = vector.load %arg2[%c0_2, %c0_3, %c0_4, %c0_5] : memref<1x4x16x128xbf16, #tpu.memory_space<vmem>>, vector<1x1x16x128xbf16>
    %18 = vector.shape_cast %17 : vector<1x1x16x128xbf16> to vector<16x128xbf16>
    %19 = arith.extf %18 : vector<16x128xbf16> to vector<16x128xf32>
    %20 = vector.extract_strided_slice %1 {offsets = [8, 0], sizes = [1, 128], strides = [1, 1]} : vector<20x128xf32> to vector<1x128xf32>
    %21 = vector.broadcast %20 : vector<1x128xf32> to vector<16x128xf32>
    %22 = arith.mulf %19, %21 : vector<16x128xf32>
    %c0_6 = arith.constant 0 : index
    %c1 = arith.constant 1 : index
    %c0_7 = arith.constant 0 : index
    %c0_8 = arith.constant 0 : index
    %23 = vector.load %arg2[%c0_6, %c1, %c0_7, %c0_8] : memref<1x4x16x128xbf16, #tpu.memory_space<vmem>>, vector<1x1x16x128xbf16>
    %24 = vector.shape_cast %23 : vector<1x1x16x128xbf16> to vector<16x128xbf16>
    %25 = arith.extf %24 : vector<16x128xbf16> to vector<16x128xf32>
    %26 = vector.extract_strided_slice %1 {offsets = [9, 0], sizes = [1, 128], strides = [1, 1]} : vector<20x128xf32> to vector<1x128xf32>
    %27 = vector.broadcast %26 : vector<1x128xf32> to vector<16x128xf32>
    %28 = arith.mulf %25, %27 : vector<16x128xf32>
    %29 = arith.addf %22, %28 : vector<16x128xf32>
    %c0_9 = arith.constant 0 : index
    %c2 = arith.constant 2 : index
    %c0_10 = arith.constant 0 : index
    %c0_11 = arith.constant 0 : index
    %30 = vector.load %arg2[%c0_9, %c2, %c0_10, %c0_11] : memref<1x4x16x128xbf16, #tpu.memory_space<vmem>>, vector<1x1x16x128xbf16>
    %31 = vector.shape_cast %30 : vector<1x1x16x128xbf16> to vector<16x128xbf16>
    %32 = arith.extf %31 : vector<16x128xbf16> to vector<16x128xf32>
    %33 = vector.extract_strided_slice %1 {offsets = [10, 0], sizes = [1, 128], strides = [1, 1]} : vector<20x128xf32> to vector<1x128xf32>
    %34 = vector.broadcast %33 : vector<1x128xf32> to vector<16x128xf32>
    %35 = arith.mulf %32, %34 : vector<16x128xf32>
    %36 = arith.addf %29, %35 : vector<16x128xf32>
    %c0_12 = arith.constant 0 : index
    %c3 = arith.constant 3 : index
    %c0_13 = arith.constant 0 : index
    %c0_14 = arith.constant 0 : index
    %37 = vector.load %arg2[%c0_12, %c3, %c0_13, %c0_14] : memref<1x4x16x128xbf16, #tpu.memory_space<vmem>>, vector<1x1x16x128xbf16>
    %38 = vector.shape_cast %37 : vector<1x1x16x128xbf16> to vector<16x128xbf16>
    %39 = arith.extf %38 : vector<16x128xbf16> to vector<16x128xf32>
    %40 = vector.extract_strided_slice %1 {offsets = [11, 0], sizes = [1, 128], strides = [1, 1]} : vector<20x128xf32> to vector<1x128xf32>
    %41 = vector.broadcast %40 : vector<1x128xf32> to vector<16x128xf32>
    %42 = arith.mulf %39, %41 : vector<16x128xf32>
    %43 = arith.addf %36, %42 : vector<16x128xf32>
    %44 = vector.broadcast %16 : vector<1x128xf32> to vector<16x128xf32>
    %45 = arith.mulf %43, %44 : vector<16x128xf32>
    %c0_15 = arith.constant 0 : index
    %c0_16 = arith.constant 0 : index
    %c0_17 = arith.constant 0 : index
    %46 = vector.load %arg5[%c0_15, %c0_16, %c0_17] : memref<1x64x128xf32, #tpu.memory_space<vmem>>, vector<1x16x128xf32>
    %47 = vector.shape_cast %46 : vector<1x16x128xf32> to vector<16x128xf32>
    %48 = vector.shape_cast %45 : vector<16x128xf32> to vector<1x16x128xf32>
    tpu.vector_store %arg5[%c0_15, %c0_16, %c0_17], %48 {strides = array<i32>} : memref<1x64x128xf32, #tpu.memory_space<vmem>>, vector<1x16x128xf32>,
    %c0_18 = arith.constant 0 : index
    %c0_19 = arith.constant 0 : index
    %c0_20 = arith.constant 0 : index
    %c0_21 = arith.constant 0 : index
    %49 = vector.load %arg3[%c0_18, %c0_19, %c0_20, %c0_21] : memref<1x4x16x128xbf16, #tpu.memory_space<vmem>>, vector<1x1x16x128xbf16>
    %50 = vector.shape_cast %49 : vector<1x1x16x128xbf16> to vector<16x128xbf16>
    %51 = arith.extf %50 : vector<16x128xbf16> to vector<16x128xf32>
    %52 = vector.extract_strided_slice %1 {offsets = [12, 0], sizes = [1, 128], strides = [1, 1]} : vector<20x128xf32> to vector<1x128xf32>
    %53 = vector.broadcast %52 : vector<1x128xf32> to vector<16x128xf32>
    %54 = arith.mulf %51, %53 : vector<16x128xf32>
    %c0_22 = arith.constant 0 : index
    %c1_23 = arith.constant 1 : index
    %c0_24 = arith.constant 0 : index
    %c0_25 = arith.constant 0 : index
    %55 = vector.load %arg3[%c0_22, %c1_23, %c0_24, %c0_25] : memref<1x4x16x128xbf16, #tpu.memory_space<vmem>>, vector<1x1x16x128xbf16>
    %56 = vector.shape_cast %55 : vector<1x1x16x128xbf16> to vector<16x128xbf16>
    %57 = arith.extf %56 : vector<16x128xbf16> to vector<16x128xf32>
    %58 = vector.extract_strided_slice %1 {offsets = [13, 0], sizes = [1, 128], strides = [1, 1]} : vector<20x128xf32> to vector<1x128xf32>
    %59 = vector.broadcast %58 : vector<1x128xf32> to vector<16x128xf32>
    %60 = arith.mulf %57, %59 : vector<16x128xf32>
    %61 = arith.addf %54, %60 : vector<16x128xf32>
    %c0_26 = arith.constant 0 : index
    %c2_27 = arith.constant 2 : index
    %c0_28 = arith.constant 0 : index
    %c0_29 = arith.constant 0 : index
    %62 = vector.load %arg3[%c0_26, %c2_27, %c0_28, %c0_29] : memref<1x4x16x128xbf16, #tpu.memory_space<vmem>>, vector<1x1x16x128xbf16>
    %63 = vector.shape_cast %62 : vector<1x1x16x128xbf16> to vector<16x128xbf16>
    %64 = arith.extf %63 : vector<16x128xbf16> to vector<16x128xf32>
    %65 = vector.extract_strided_slice %1 {offsets = [14, 0], sizes = [1, 128], strides = [1, 1]} : vector<20x128xf32> to vector<1x128xf32>
    %66 = vector.broadcast %65 : vector<1x128xf32> to vector<16x128xf32>
    %67 = arith.mulf %64, %66 : vector<16x128xf32>
    %68 = arith.addf %61, %67 : vector<16x128xf32>
    %c0_30 = arith.constant 0 : index
    %c3_31 = arith.constant 3 : index
    %c0_32 = arith.constant 0 : index
    %c0_33 = arith.constant 0 : index
    %69 = vector.load %arg3[%c0_30, %c3_31, %c0_32, %c0_33] : memref<1x4x16x128xbf16, #tpu.memory_space<vmem>>, vector<1x1x16x128xbf16>
    %70 = vector.shape_cast %69 : vector<1x1x16x128xbf16> to vector<16x128xbf16>
    %71 = arith.extf %70 : vector<16x128xbf16> to vector<16x128xf32>
    %72 = vector.extract_strided_slice %1 {offsets = [15, 0], sizes = [1, 128], strides = [1, 1]} : vector<20x128xf32> to vector<1x128xf32>
    %73 = vector.broadcast %72 : vector<1x128xf32> to vector<16x128xf32>
    %74 = arith.mulf %71, %73 : vector<16x128xf32>
    %75 = arith.addf %68, %74 : vector<16x128xf32>
    %76 = vector.broadcast %16 : vector<1x128xf32> to vector<16x128xf32>
    %77 = arith.mulf %75, %76 : vector<16x128xf32>
    %c0_34 = arith.constant 0 : index
    %c16 = arith.constant 16 : index
    %c0_35 = arith.constant 0 : index
    %78 = vector.load %arg5[%c0_34, %c16, %c0_35] : memref<1x64x128xf32, #tpu.memory_space<vmem>>, vector<1x16x128xf32>
    %79 = vector.shape_cast %78 : vector<1x16x128xf32> to vector<16x128xf32>
    %80 = vector.shape_cast %77 : vector<16x128xf32> to vector<1x16x128xf32>
    tpu.vector_store %arg5[%c0_34, %c16, %c0_35], %80 {strides = array<i32>} : memref<1x64x128xf32, #tpu.memory_space<vmem>>, vector<1x16x128xf32>,
    %c0_36 = arith.constant 0 : index
    %c0_37 = arith.constant 0 : index
    %c0_38 = arith.constant 0 : index
    %c0_39 = arith.constant 0 : index
    %81 = vector.load %arg4[%c0_36, %c0_37, %c0_38, %c0_39] : memref<1x4x32x128xbf16, #tpu.memory_space<vmem>>, vector<1x1x32x128xbf16>
    %82 = vector.shape_cast %81 : vector<1x1x32x128xbf16> to vector<32x128xbf16>
    %83 = arith.extf %82 : vector<32x128xbf16> to vector<32x128xf32>
    %84 = vector.extract_strided_slice %1 {offsets = [16, 0], sizes = [1, 128], strides = [1, 1]} : vector<20x128xf32> to vector<1x128xf32>
    %85 = vector.broadcast %84 : vector<1x128xf32> to vector<32x128xf32>
    %86 = arith.mulf %83, %85 : vector<32x128xf32>
    %c0_40 = arith.constant 0 : index
    %c1_41 = arith.constant 1 : index
    %c0_42 = arith.constant 0 : index
    %c0_43 = arith.constant 0 : index
    %87 = vector.load %arg4[%c0_40, %c1_41, %c0_42, %c0_43] : memref<1x4x32x128xbf16, #tpu.memory_space<vmem>>, vector<1x1x32x128xbf16>
    %88 = vector.shape_cast %87 : vector<1x1x32x128xbf16> to vector<32x128xbf16>
    %89 = arith.extf %88 : vector<32x128xbf16> to vector<32x128xf32>
    %90 = vector.extract_strided_slice %1 {offsets = [17, 0], sizes = [1, 128], strides = [1, 1]} : vector<20x128xf32> to vector<1x128xf32>
    %91 = vector.broadcast %90 : vector<1x128xf32> to vector<32x128xf32>
    %92 = arith.mulf %89, %91 : vector<32x128xf32>
    %93 = arith.addf %86, %92 : vector<32x128xf32>
    %c0_44 = arith.constant 0 : index
    %c2_45 = arith.constant 2 : index
    %c0_46 = arith.constant 0 : index
    %c0_47 = arith.constant 0 : index
    %94 = vector.load %arg4[%c0_44, %c2_45, %c0_46, %c0_47] : memref<1x4x32x128xbf16, #tpu.memory_space<vmem>>, vector<1x1x32x128xbf16>
    %95 = vector.shape_cast %94 : vector<1x1x32x128xbf16> to vector<32x128xbf16>
    %96 = arith.extf %95 : vector<32x128xbf16> to vector<32x128xf32>
    %97 = vector.extract_strided_slice %1 {offsets = [18, 0], sizes = [1, 128], strides = [1, 1]} : vector<20x128xf32> to vector<1x128xf32>
    %98 = vector.broadcast %97 : vector<1x128xf32> to vector<32x128xf32>
    %99 = arith.mulf %96, %98 : vector<32x128xf32>
    %100 = arith.addf %93, %99 : vector<32x128xf32>
    %c0_48 = arith.constant 0 : index
    %c3_49 = arith.constant 3 : index
    %c0_50 = arith.constant 0 : index
    %c0_51 = arith.constant 0 : index
    %101 = vector.load %arg4[%c0_48, %c3_49, %c0_50, %c0_51] : memref<1x4x32x128xbf16, #tpu.memory_space<vmem>>, vector<1x1x32x128xbf16>
    %102 = vector.shape_cast %101 : vector<1x1x32x128xbf16> to vector<32x128xbf16>
    %103 = arith.extf %102 : vector<32x128xbf16> to vector<32x128xf32>
    %104 = vector.extract_strided_slice %1 {offsets = [19, 0], sizes = [1, 128], strides = [1, 1]} : vector<20x128xf32> to vector<1x128xf32>
    %105 = vector.broadcast %104 : vector<1x128xf32> to vector<32x128xf32>
    %106 = arith.mulf %103, %105 : vector<32x128xf32>
    %107 = arith.addf %100, %106 : vector<32x128xf32>
    %108 = vector.broadcast %16 : vector<1x128xf32> to vector<32x128xf32>
    %109 = arith.mulf %107, %108 : vector<32x128xf32>
    %c0_52 = arith.constant 0 : index
    %c32 = arith.constant 32 : index
    %c0_53 = arith.constant 0 : index
    %110 = vector.load %arg5[%c0_52, %c32, %c0_53] : memref<1x64x128xf32, #tpu.memory_space<vmem>>, vector<1x32x128xf32>
    %111 = vector.shape_cast %110 : vector<1x32x128xf32> to vector<32x128xf32>
    %112 = vector.shape_cast %109 : vector<32x128xf32> to vector<1x32x128xf32>
    tpu.vector_store %arg5[%c0_52, %c32, %c0_53], %112 {strides = array<i32>} : memref<1x64x128xf32, #tpu.memory_space<vmem>>, vector<1x32x128xf32>,
    return
  }
  func.func @transform_0(%arg0: i32) -> (i32, i32, i32) {
    %c0_i32 = arith.constant 0 : i32
    %c0_i32_0 = arith.constant 0 : i32
    %c0_i32_1 = arith.constant 0 : i32
    return %arg0, %c0_i32, %c0_i32_0 : i32, i32, i32
  }
  func.func @transform_1(%arg0: i32) -> (i32, i32, i32, i32) {
    %c0_i32 = arith.constant 0 : i32
    %c0_i32_0 = arith.constant 0 : i32
    %c0_i32_1 = arith.constant 0 : i32
    %c0_i32_2 = arith.constant 0 : i32
    return %arg0, %c0_i32, %c0_i32_0, %c0_i32_1 : i32, i32, i32, i32
  }
  func.func @transform_2(%arg0: i32) -> (i32, i32, i32, i32) {
    %c0_i32 = arith.constant 0 : i32
    %c0_i32_0 = arith.constant 0 : i32
    %c0_i32_1 = arith.constant 0 : i32
    %c0_i32_2 = arith.constant 0 : i32
    return %arg0, %c0_i32, %c0_i32_0, %c0_i32_1 : i32, i32, i32, i32
  }
  func.func @transform_3(%arg0: i32) -> (i32, i32, i32, i32) {
    %c0_i32 = arith.constant 0 : i32
    %c0_i32_0 = arith.constant 0 : i32
    %c0_i32_1 = arith.constant 0 : i32
    %c0_i32_2 = arith.constant 0 : i32
    return %arg0, %c0_i32, %c0_i32_0, %c0_i32_1 : i32, i32, i32, i32
  }
  func.func @transform_4(%arg0: i32) -> (i32, i32, i32) {
    %c0_i32 = arith.constant 0 : i32
    %c0_i32_0 = arith.constant 0 : i32
    %c0_i32_1 = arith.constant 0 : i32
    return %arg0, %c0_i32, %c0_i32_0 : i32, i32, i32
  }
}

</mosaic_0001>

<bundles_post_ra>
// kernel: backbone_forward.4
= control target key start
LH: loop header
LB: loop body
LE: loop exit
PB: predicated region body
PF: predicated region fallthrough
CT: control target
= control target key end

     0   :  { %s571_s12 = smov 0   ;;  %s641_s0 = inlined_call_operand.vmem [shape: bf16[2,16,64], index: 0, kind: input, shape index: {}]   ;;  %s642_s1 = inlined_call_operand.vmem [shape: bf16[16,144], index: 1, kind: input, shape index: {}]   ;;  %s643_s2 = inlined_call_operand.vmem [shape: f32[16,1], index: 2, kind: input, shape index: {}]   ;;  %s644_s3 = inlined_call_operand.vmem [shape: bf16[2,16,128], index: 3, kind: output, shape index: {}]  }
   0x1 LB: > { %s481_s13 = sadd.s32 4294967295, %s539_s12   ;;  %p485_p0 = scmp.ge.s32.totalorder %s539_s12, 1  ;;  %s539_s12 = sphi %s571_s12, %s13_s12  }
   0x2   : > { %p137_p1 = scmp.lt.s32.totalorder %s539_s12, 3 }
   0x4   : > { %p138_p2 = pnand %p485_p0, %p137_p1 }
   0x5   : > { %v172_v0 = vlaneseq (!%p138_p2)  ;;  %v541_v1 = vmov (!%p138_p2), 0   ;;  %p161_p3 = scmp.lt.s32.totalorder (!%p138_p2), %s481_s13, 1  ;;  %v542_v4 = vmov (!%p138_p2), 0.0   ;;  %vm205_vm2 = vcmask (!%p138_p2), 523264   ;;  %s543_s18 = smov (!%p138_p2), 119   ;;  %v348_v30 = vld [vmem:[%s643_s2] sm:$0xff] (!%p138_p2) }
   0x6   : > { %141 = sbr.rel (%p138_p2) target bundleno = 504 (0x1f8), region = 32  ;;  %195 = vst [vmem:[#allocation2 + $0x8] sm:$0xff] (!%p138_p2), %v541_v1  ;;  %373 = vmatprep.subr.bf16.mxu0 (!%p138_p2), %v541_v1  ;;  %527 = vset.pattern.permute.xlu0 (!%p138_p2), %v541_v1  ;;  %s544_s19 = smov (!%p138_p2), 127   ;;  %v532_v26 = vld [vmem:[%s642_s1 + $0x4] ss:$8 sps:$4 sm:$0xff] (!%p138_p2)   ;;  %vm369_vm3 = vcmask (!%p138_p2), 130048  }
   0x7   : > { %v173_v2 = vand.u32 (!%p138_p2), 127, %v172_v0  ;;  %528 = vset.pattern.permute.xlu1 (!%p138_p2), %v541_v1  ;;  %s545_s20 = smov (!%p138_p2), 121   ;;  %s546_s21 = smov (!%p138_p2), 1   ;;  %495 = vmatprep.mubr.msk.bf16.mxu0 (!%p138_p2), %vm369_vm3, %v532_v26  ;;  %v349_v31 = vld [vmem:[%s643_s2 + $0x8] sm:$0xff] (!%p138_p2)  ;;  %vm221_vm4 = vcmask (!%p138_p2), 72704   ;;  %vm233_vm5 = vcmask (!%p138_p2), 64512  }
   0x8   : > { %s547_s22 = smov (!%p138_p2), 7   ;;  %s548_s23 = smov (!%p138_p2), 9   ;;  %vm251_vm6 = vcmask (!%p138_p2), 56320   ;;  %vm268_vm7 = vcmask (!%p138_p2), 7168   ;;  %vm287_vm8 = vcmask (!%p138_p2), 1039360   ;;  %vm304_vm9 = vcmask (!%p138_p2), 990208  }
   0x9   : > { %v178_v3 = vand.u32 (!%p138_p2), 7, %v173_v2  ;;  %s549_s24 = smov (!%p138_p2), 8   ;;  %s550_s27 = smov (!%p138_p2), 120   ;;  %vm316_vm10 = vcmask (!%p138_p2), 982016   ;;  %vm333_vm11 = vcmask (!%p138_p2), 973824  }
   0xa   : > { %v530_v56 = vld [vmem:[%s642_s1] ss:$8 sps:$4 sm:$0xff] (!%p138_p2)  }
   0xb   : > { %vm186_vm0 = vcmp.ne.s32.totalorder (!%p138_p2), %v178_v3, 0  ;;  %vm190_vm1 = vcmp.ne.s32.totalorder (!%p138_p2), %v178_v3, 7 }
   0xc   : > { %v490_v5 = vsel (!%p138_p2), %vm186_vm0, 1.0, %v542_v4  ;;  %v491_v6 = vsel (!%p138_p2), %vm190_vm1, 1.0, %v542_v4 }
   0xd   : > { %s646_s13 = smov (!%p161_p3, %s481_s13), 1  ;;  %v189_v7 = vpack.c.bf16 %v490_v5, %v490_v5  ;;  %v193_v9 = vpack.c.bf16 %v491_v6, %v491_v6 }
   0xe   : > { %s500_s14 = sshll.u32 %s646_s13, 3 }
   0xf   : > { %s165_s17 = scalar_lea.vmem %s641_s0, %s500_s14  ;;  %210 = vrot.lane.b32.xlu0 %v189_v7, %s543_s18  ;;  %257 = vrot.lane.b32.xlu1 %v189_v7, %s544_s19  ;;  %s170_s9 = scalar_lea.vmem %s644_s3, %s500_s14 }
  0x10   : > { %v529_v8 = vld [vmem:[%s165_s17] sm:$0xff]  }
  0x11   : > { %206 = vst.msk [vmem:[#allocation2 + $0x8] sm:$0xff] %vm205_vm2, %v529_v8 }
  0x13   : > { %240 = vrot.lane.b32.xlu0 %v193_v9, %s545_s20  ;;  %276 = vrot.lane.b32.xlu1 %v193_v9, %s546_s21 }
  0x17   : > { %293 = vrot.lane.b32.xlu0 %v189_v7, %s547_s22  ;;  %322 = vrot.lane.b32.xlu1 %v193_v9, %s548_s23 }
  0x18   : > { %v594_v10 = vld [vmem:[#allocation2 + $0x8] sm:$0xff] }
  0x81   : > { %v211_v11 = vpop.permute.xlu0 %210  ;;  %v258_v17 = vpop.permute.xlu1 %257 }
  0x82   : > { %v213_v12 = vmul.bf16 0, %v211_v11  ;;  %v214_v13 = vmul.bf16 %v211_v11, %v594_v10  ;;  %v260_v18 = vmul.bf16 0, %v258_v17  ;;  %v261_v19 = vmul.bf16 %v258_v17, %v594_v10 }
  0x84   : > { %217 = vrot.lane.b32.xlu0 %v213_v12, %s548_s23  ;;  %219 = vrot.lane.b32.xlu1 %v214_v13, %s548_s23 }
  0x85   : > { %v241_v14 = vpop.permute.xlu0 %240  ;;  %v277_v20 = vpop.permute.xlu1 %276 }
  0x86   : > { %v243_v15 = vmul.bf16 0, %v241_v14  ;;  %v244_v16 = vmul.bf16 %v241_v14, %v594_v10  ;;  %v279_v21 = vmul.bf16 %v277_v20, %v594_v10  ;;  %v280_v22 = vmul.bf16 0, %v277_v20 }
  0x88   : > { %229 = vrot.lane.b32.xlu0 %v541_v1, %s549_s24  ;;  %231 = vrot.lane.b32.xlu1 %v594_v10, %s549_s24 }
  0x89   : > { %v294_v23 = vpop.permute.xlu0 %293  ;;  %v323_v27 = vpop.permute.xlu1 %322 }
  0x8a   : > { %v296_v24 = vmul.bf16 %v294_v23, %v594_v10  ;;  %v297_v25 = vmul.bf16 0, %v294_v23  ;;  %v325_v28 = vmul.bf16 %v323_v27, %v594_v10  ;;  %v326_v29 = vmul.bf16 0, %v323_v27 }
  0x8c   : > { %247 = vrot.lane.b32.xlu0 %v243_v15, %s547_s22  ;;  %249 = vrot.lane.b32.xlu1 %v244_v16, %s547_s22 }
  0x90   : > { %264 = vrot.lane.b32.xlu0 %v260_v18, %s546_s21  ;;  %266 = vrot.lane.b32.xlu1 %v261_v19, %s546_s21 }
  0x94   : > { %283 = vrot.lane.b32.xlu0 %v279_v21, %s544_s19  ;;  %285 = vrot.lane.b32.xlu1 %v280_v22, %s544_s19 }
  0x98   : > { %300 = vrot.lane.b32.xlu0 %v296_v24, %s545_s20  ;;  %302 = vrot.lane.b32.xlu1 %v297_v25, %s545_s20 }
  0x9c   : > { %312 = vrot.lane.b32.xlu0 %v594_v10, %s550_s27  ;;  %314 = vrot.lane.b32.xlu1 %v541_v1, %s550_s27 }
  0xa0   : > { %329 = vrot.lane.b32.xlu0 %v325_v28, %s543_s18  ;;  %331 = vrot.lane.b32.xlu1 %v326_v29, %s543_s18 }
  0xa4   : > { %352 = vperm.xlu0 %527, %v348_v30   ;;  %357 = vperm.xlu1 %528, %v349_v31  }
  0xf6   : > { %v218_v32 = vpop.permute.xlu0 %217  ;;  %v220_v33 = vpop.permute.xlu1 %219 }
  0xf7   : > { %v222_v34 = vsel %vm221_vm4, %v218_v32, %v220_v33 }
  0xf8   : > { %374 = vmatpush1.bf16.msra.mxu0 %v222_v34 }
  0xf9   : > { %375 = vmatprep.subr.bf16.mxu0 %v541_v1 }
  0xfa   : > { %v230_v35 = vpop.permute.xlu0 %229  ;;  %v232_v36 = vpop.permute.xlu1 %231 }
  0xfb   : > { %v234_v37 = vsel %vm233_vm5, %v230_v35, %v232_v36 }
  0xfc   : > { %376 = vmatpush1.bf16.msra.mxu0 %v234_v37 }
  0xfd   : > { %377 = vmatprep.subr.bf16.mxu0 %v541_v1 }
  0xfe   : > { %v248_v38 = vpop.permute.xlu0 %247  ;;  %v250_v39 = vpop.permute.xlu1 %249 }
  0xff   : > { %v252_v40 = vsel %vm251_vm6, %v248_v38, %v250_v39 }
 0x100   : > { %378 = vmatpush1.bf16.msra.mxu0 %v252_v40 }
 0x101   : > { %379 = vmatprep.subr.bf16.mxu0 %v541_v1 }
 0x102   : > { %v265_v41 = vpop.permute.xlu0 %264  ;;  %v267_v42 = vpop.permute.xlu1 %266 }
 0x103   : > { %v269_v43 = vsel %vm268_vm7, %v265_v41, %v267_v42 }
 0x104   : > { %380 = vmatpush1.bf16.msra.mxu0 %v269_v43 }
 0x105   : > { %381 = vmatprep.subr.bf16.mxu0 %v541_v1 }
 0x106   : > { %v284_v44 = vpop.permute.xlu0 %283  ;;  %v286_v45 = vpop.permute.xlu1 %285 }
 0x107   : > { %v288_v46 = vsel %vm287_vm8, %v284_v44, %v286_v45 }
 0x108   : > { %382 = vmatpush1.bf16.msra.mxu0 %v594_v10 }
 0x109   : > { %383 = vmatprep.subr.bf16.mxu0 %v541_v1 }
 0x10a   : > { %v301_v47 = vpop.permute.xlu0 %300  ;;  %v303_v48 = vpop.permute.xlu1 %302 }
 0x10b   : > { %v305_v49 = vsel %vm304_vm9, %v301_v47, %v303_v48 }
 0x10c   : > { %384 = vmatpush1.bf16.msra.mxu0 %v288_v46 }
 0x10d   : > { %385 = vmatprep.subr.bf16.mxu0 %v541_v1 }
 0x10e   : > { %v313_v50 = vpop.permute.xlu0 %312  ;;  %v315_v51 = vpop.permute.xlu1 %314 }
 0x10f   : > { %v317_v52 = vsel %vm316_vm10, %v313_v50, %v315_v51 }
 0x110   : > { %386 = vmatpush1.bf16.msra.mxu0 %v305_v49 }
 0x111   : > { %387 = vmatprep.subr.bf16.mxu0 %v541_v1 }
 0x112   : > { %v330_v53 = vpop.permute.xlu0 %329  ;;  %v332_v54 = vpop.permute.xlu1 %331 }
 0x113   : > { %v334_v55 = vsel %vm333_vm11, %v330_v53, %v332_v54 }
 0x114   : > { %388 = vmatpush1.bf16.msra.mxu0 %v317_v52 }
 0x115   : > { %389 = vmatprep.subr.bf16.mxu0 %v541_v1 }
 0x118   : > { %390 = vmatpush1.bf16.msra.mxu0 %v334_v55 }
 0x11b   : > { %406 = vmatmul.mubr.bf16.vlgmr.msra.gmra.mrb[0].mxu0 %v530_v56 }
 0x123   : > { %v353_v57 = vpop.permute.xlu0 %352  ;;  %v358_v59 = vpop.permute.xlu1 %357 }
 0x1ee   : > { %v407_v58 = vpop.f32.mrb[0].mxu0 }
 0x1ef   : > { %v408_v60 = vadd.f32 %v407_v58, %v353_v57  ;;  %v409_v61 = vpop.f32.mrb[1].mxu0 }
 0x1f0   : > { %v410_v62 = vpop.f32.mrb[2].mxu0 }
 0x1f1   : > { %v411_v63 = vadd.f32 %v410_v62, %v358_v59  ;;  %v412_v0 = vpop.f32.mrb[3].mxu0  ;;  %v414_v2 = vmax.f32 %v408_v60, 0.0 }
 0x1f3   : > { %v415_v3 = vmax.f32 %v411_v63, 0.0 }
 0x1f5   : > { %v507_v1 = vpack.c.bf16 %v415_v3, %v414_v2 }
 0x1f7   : > { %508 = vst [vmem:[%s170_s9] sm:$0xff] %v507_v1  }
 0x1f8 PF: > { %s13_s12 = sadd.s32 1, %s539_s12  }
 0x1f9   : > { %p10_p4 = scmp.ge.s32.totalorder %s13_s12, 4  }
 0x1fb   :  { %12 = sbr.rel (!%p10_p4) target bundleno = 1 (0x1), region = 62 }

// kernel: backbone_forward.5
= control target key start
LH: loop header
LB: loop body
LE: loop exit
PB: predicated region body
PF: predicated region fallthrough
CT: control target
= control target key end

     0   :  { %s836_s18 = smov 0   ;;  %s1028_s0 = inlined_call_operand.vmem [shape: bf16[2,16,16], index: 0, kind: input, shape index: {}]   ;;  %s1029_s1 = inlined_call_operand.vmem [shape: bf16[16,144], index: 1, kind: input, shape index: {}]   ;;  %s1030_s2 = inlined_call_operand.vmem [shape: f32[16,1], index: 2, kind: input, shape index: {}]   ;;  %s1031_s3 = inlined_call_operand.vmem [shape: bf16[16,144], index: 3, kind: input, shape index: {}]   ;;  %s1032_s4 = inlined_call_operand.vmem [shape: f32[16,1], index: 4, kind: input, shape index: {}]   ;;  %s1033_s5 = inlined_call_operand.vmem [shape: bf16[2,16,128], index: 5, kind: output, shape index: {}]  }
   0x1 LB: > { %s729_s19 = sadd.s32 4294967295, %s794_s18   ;;  %p733_p0 = scmp.ge.s32.totalorder %s794_s18, 1  ;;  %s794_s18 = sphi %s836_s18, %s15_s18  }
   0x2   : > { %p187_p1 = scmp.lt.s32.totalorder %s794_s18, 3 }
   0x4   : > { %p188_p2 = pnand %p733_p0, %p187_p1 }
   0x5   : > { %v226_v0 = vlaneseq (!%p188_p2)  ;;  %v796_v1 = vmov (!%p188_p2), 0   ;;  %p215_p3 = scmp.lt.s32.totalorder (!%p188_p2), %s729_s19, 1  ;;  %v797_v4 = vmov (!%p188_p2), 0.0   ;;  %vm262_vm2 = vcmask (!%p188_p2), 130048   ;;  %s798_s24 = smov (!%p188_p2), 123   ;;  %v406_v30 = vld [vmem:[%s1030_s2 + $0x8] sm:$0xff] (!%p188_p2) }
   0x6   : > { %191 = sbr.rel (%p188_p2) target bundleno = 881 (0x371), region = 40  ;;  %252 = vst [vmem:[#allocation2 + $0x8] sm:$0xff] (!%p188_p2), %v796_v1  ;;  %780 = vset.pattern.permute.xlu1 (!%p188_p2), %v796_v1  ;;  %429 = vmatprep.subr.bf16.mxu0 (!%p188_p2), %v796_v1  ;;  %s799_s25 = smov (!%p188_p2), 127   ;;  %v784_v26 = vld [vmem:[%s1029_s1 + $0x4] ss:$8 sps:$4 sm:$0xff] (!%p188_p2)   ;;  %vm278_vm3 = vcmask (!%p188_p2), 39936  }
   0x7   : > { %v847_v2 = vand.u32 (!%p188_p2), 127, %v226_v0  ;;  %779 = vset.pattern.permute.xlu0 (!%p188_p2), %v796_v1  ;;  %621 = vmatprep.subr.bf16.mxu1 (!%p188_p2), %v796_v1  ;;  %s800_s26 = smov (!%p188_p2), 125   ;;  %s801_s27 = smov (!%p188_p2), 1   ;;  %v405_v31 = vld [vmem:[%s1030_s2] sm:$0xff] (!%p188_p2)  ;;  %vm290_vm4 = vcmask (!%p188_p2), 31744   ;;  %vm308_vm5 = vcmask (!%p188_p2), 23552  }
   0x8   : > { %s802_s28 = smov (!%p188_p2), 3   ;;  %s803_s29 = smov (!%p188_p2), 5   ;;  %744 = vmatprep.mubr.msk.bf16.mxu0 (!%p188_p2), %vm262_vm2, %v784_v26  ;;  %vm325_vm6 = vcmask (!%p188_p2), 7168   ;;  %vm344_vm7 = vcmask (!%p188_p2), 1039360   ;;  %vm361_vm8 = vcmask (!%p188_p2), 1022976   ;;  %vm373_vm9 = vcmask (!%p188_p2), 1014784  }
   0x9   : > { %v232_v3 = vand.u32 (!%p188_p2), 3, %v847_v2  ;;  %s804_s30 = smov (!%p188_p2), 4   ;;  %s805_s8 = smov (!%p188_p2), 124   ;;  %vm390_vm10 = vcmask (!%p188_p2), 1006592   ;;  %v782_v56 = vld [vmem:[%s1029_s1] ss:$8 sps:$4 sm:$0xff] (!%p188_p2)  }
   0xa   : > { %vm248_vm11 = vcmp.lt.s32.totalorder (!%p188_p2), %v847_v2, 16 }
   0xb   : > { %vm240_vm0 = vcmp.ne.s32.totalorder (!%p188_p2), %v232_v3, 0  ;;  %vm244_vm1 = vcmp.ne.s32.totalorder (!%p188_p2), %v232_v3, 3 }
   0xc   : > { %v738_v5 = vsel (!%p188_p2), %vm240_vm0, 1.0, %v797_v4  ;;  %v739_v6 = vsel (!%p188_p2), %vm244_vm1, 1.0, %v797_v4 }
   0xd   : > { %s1035_s19 = smov (!%p215_p3, %s729_s19), 1  ;;  %v243_v7 = vpack.c.bf16 %v738_v5, %v738_v5  ;;  %v247_v9 = vpack.c.bf16 %v739_v6, %v739_v6 }
   0xe   : > { %s752_s20 = sshll.u32 %s1035_s19, 3 }
   0xf   : > { %s219_s23 = scalar_lea.vmem %s1028_s0, %s752_s20  ;;  %267 = vrot.lane.b32.xlu0 %v243_v7, %s798_s24  ;;  %314 = vrot.lane.b32.xlu1 %v243_v7, %s799_s25 }
  0x10   : > { %v781_v8 = vld [vmem:[%s219_s23] sm:$0xff]  }
  0x11   : > { %263 = vst.msk [vmem:[#allocation2 + $0x8] sm:$0xff] %vm262_vm2, %v781_v8 }
  0x13   : > { %297 = vrot.lane.b32.xlu0 %v247_v9, %s800_s26  ;;  %333 = vrot.lane.b32.xlu1 %v247_v9, %s801_s27 }
  0x17   : > { %350 = vrot.lane.b32.xlu0 %v243_v7, %s802_s28  ;;  %379 = vrot.lane.b32.xlu1 %v247_v9, %s803_s29  ;;  %v740_v9 = vsel %vm248_vm11, 1.0, %v797_v4 }
  0x18   : > { %v869_v10 = vld [vmem:[#allocation2 + $0x8] sm:$0xff] }
  0x19   : > { %v471_v58 = vunpack.c.l.bf16 %v869_v10  ;;  %v472_v62 = vunpack.c.h.bf16 %v869_v10 }
  0x81   : > { %v871_v11 = vpop.permute.xlu0 %267  ;;  %v880_v15 = vpop.permute.xlu1 %314 }
  0x82   : > { %v270_v12 = vmul.bf16 0, %v871_v11  ;;  %v271_v13 = vmul.bf16 %v871_v11, %v869_v10  ;;  %v317_v18 = vmul.bf16 0, %v880_v15  ;;  %v318_v19 = vmul.bf16 %v880_v15, %v869_v10 }
  0x84   : > { %274 = vrot.lane.b32.xlu0 %v270_v12, %s803_s29  ;;  %276 = vrot.lane.b32.xlu1 %v271_v13, %s803_s29 }
  0x85   : > { %v878_v14 = vpop.permute.xlu0 %297  ;;  %v894_v20 = vpop.permute.xlu1 %333 }
  0x86   : > { %v300_v16 = vmul.bf16 0, %v878_v14  ;;  %v301_v17 = vmul.bf16 %v878_v14, %v869_v10  ;;  %v337_v21 = vmul.bf16 0, %v894_v20  ;;  %v336_v22 = vmul.bf16 %v894_v20, %v869_v10 }
  0x88   : > { %286 = vrot.lane.b32.xlu0 %v796_v1, %s804_s30  ;;  %288 = vrot.lane.b32.xlu1 %v869_v10, %s804_s30 }
  0x89   : > { %v901_v23 = vpop.permute.xlu0 %350  ;;  %v917_v27 = vpop.permute.xlu1 %379 }
  0x8a   : > { %v354_v24 = vmul.bf16 0, %v901_v23  ;;  %v353_v25 = vmul.bf16 %v901_v23, %v869_v10  ;;  %v383_v28 = vmul.bf16 0, %v917_v27  ;;  %v382_v29 = vmul.bf16 %v917_v27, %v869_v10 }
  0x8c   : > { %304 = vrot.lane.b32.xlu0 %v300_v16, %s802_s28  ;;  %306 = vrot.lane.b32.xlu1 %v301_v17, %s802_s28 }
  0x90   : > { %321 = vrot.lane.b32.xlu0 %v317_v18, %s801_s27  ;;  %323 = vrot.lane.b32.xlu1 %v318_v19, %s801_s27 }
  0x94   : > { %342 = vrot.lane.b32.xlu1 %v337_v21, %s799_s25  ;;  %340 = vrot.lane.b32.xlu0 %v336_v22, %s799_s25  ;;  %v597_v22 = vld [vmem:[%s1032_s4] sm:$0xff] }
  0x98   : > { %359 = vrot.lane.b32.xlu1 %v354_v24, %s800_s26  ;;  %357 = vrot.lane.b32.xlu0 %v353_v25, %s800_s26 }
  0x9c   : > { %371 = vrot.lane.b32.xlu1 %v796_v1, %s805_s8  ;;  %369 = vrot.lane.b32.xlu0 %v869_v10, %s805_s8 }
  0xa0   : > { %388 = vrot.lane.b32.xlu1 %v383_v28, %s798_s24  ;;  %386 = vrot.lane.b32.xlu0 %v382_v29, %s798_s24 }
  0xa4   : > { %414 = vperm.xlu1 %780, %v406_v30   ;;  %409 = vperm.xlu0 %779, %v405_v31  }
  0xa8   : > { %490 = vrot.lane.b32.xlu1 %v270_v12, %s803_s29 }
  0xac   : > { %501 = vrot.lane.b32.xlu1 %v796_v1, %s804_s30 }
  0xb0   : > { %514 = vrot.lane.b32.xlu1 %v300_v16, %s802_s28 }
  0xb4   : > { %527 = vrot.lane.b32.xlu1 %v317_v18, %s801_s27 }
  0xf6   : > { %v275_v32 = vpop.permute.xlu0 %274  ;;  %v277_v33 = vpop.permute.xlu1 %276 }
  0xf7   : > { %v279_v34 = vsel %vm278_vm3, %v275_v32, %v277_v33 }
  0xf8   : > { %430 = vmatpush1.bf16.msra.mxu0 %v279_v34 }
  0xf9   : > { %431 = vmatprep.subr.bf16.mxu0 %v796_v1 }
  0xfa   : > { %v287_v35 = vpop.permute.xlu0 %286  ;;  %v289_v36 = vpop.permute.xlu1 %288 }
  0xfb   : > { %v291_v37 = vsel %vm290_vm4, %v287_v35, %v289_v36 }
  0xfc   : > { %432 = vmatpush1.bf16.msra.mxu0 %v291_v37 }
  0xfd   : > { %433 = vmatprep.subr.bf16.mxu0 %v796_v1 }
  0xfe   : > { %v305_v38 = vpop.permute.xlu0 %304  ;;  %v307_v39 = vpop.permute.xlu1 %306 }
  0xff   : > { %v309_v40 = vsel %vm308_vm5, %v305_v38, %v307_v39 }
 0x100   : > { %434 = vmatpush1.bf16.msra.mxu0 %v309_v40 }
 0x101   : > { %435 = vmatprep.subr.bf16.mxu0 %v796_v1 }
 0x102   : > { %v322_v41 = vpop.permute.xlu0 %321  ;;  %v324_v42 = vpop.permute.xlu1 %323 }
 0x103   : > { %v326_v43 = vsel %vm325_vm6, %v322_v41, %v324_v42 }
 0x104   : > { %436 = vmatpush1.bf16.msra.mxu0 %v326_v43 }
 0x105   : > { %437 = vmatprep.subr.bf16.mxu0 %v796_v1 }
 0x106   : > { %v341_v44 = vpop.permute.xlu0 %340  ;;  %v343_v45 = vpop.permute.xlu1 %342 }
 0x107   : > { %v345_v46 = vsel %vm344_vm7, %v341_v44, %v343_v45  ;;  %v785_v45 = vld [vmem:[%s1031_s3] ss:$8 sps:$4 sm:$0xff]  }
 0x108   : > { %438 = vmatpush1.bf16.msra.mxu0 %v869_v10 }
 0x109   : > { %439 = vmatprep.subr.bf16.mxu0 %v796_v1 }
 0x10a   : > { %v358_v47 = vpop.permute.xlu0 %357  ;;  %v360_v48 = vpop.permute.xlu1 %359 }
 0x10b   : > { %v362_v49 = vsel %vm361_vm8, %v358_v47, %v360_v48 }
 0x10c   : > { %440 = vmatpush1.bf16.msra.mxu0 %v345_v46 }
 0x10d   : > { %441 = vmatprep.subr.bf16.mxu0 %v796_v1 }
 0x10e   : > { %v370_v50 = vpop.permute.xlu0 %369  ;;  %v372_v51 = vpop.permute.xlu1 %371 }
 0x10f   : > { %v374_v52 = vsel %vm373_vm9, %v370_v50, %v372_v51 }
 0x110   : > { %442 = vmatpush1.bf16.msra.mxu0 %v362_v49 }
 0x111   : > { %443 = vmatprep.subr.bf16.mxu0 %v796_v1 }
 0x112   : > { %v387_v53 = vpop.permute.xlu0 %386  ;;  %v389_v54 = vpop.permute.xlu1 %388 }
 0x113   : > { %v391_v55 = vsel %vm390_vm10, %v387_v53, %v389_v54 }
 0x114   : > { %444 = vmatpush1.bf16.msra.mxu0 %v374_v52 }
 0x115   : > { %445 = vmatprep.subr.bf16.mxu0 %v796_v1 }
 0x118   : > { %446 = vmatpush1.bf16.msra.mxu0 %v391_v55 }
 0x11b   : > { %462 = vmatmul.mubr.bf16.vlgmr.msra.gmra.mrb[0].mxu0 %v782_v56 }
 0x123   : > { %v410_v57 = vpop.permute.xlu0 %409  ;;  %v415_v63 = vpop.permute.xlu1 %414 }
 0x1ee   : > { %v463_v59 = vpop.f32.mrb[0].mxu0 }
 0x1ef   : > { %v464_v60 = vadd.f32 %v463_v59, %v410_v57  ;;  %v465_v61 = vpop.f32.mrb[1].mxu0 }
 0x1f0   : > { %v466_v0 = vpop.f32.mrb[2].mxu0 }
 0x1f1   : > { %v473_v3 = vadd.f32 %v471_v58, %v464_v60  ;;  %v467_v5 = vadd.f32 %v466_v0, %v415_v63  ;;  %v468_v6 = vpop.f32.mrb[3].mxu0 }
 0x1f3   : > { %v475_v7 = vmax.f32 %v473_v3, 0.0  ;;  %v474_v8 = vadd.f32 %v472_v62, %v467_v5 }
 0x1f5   : > { %v476_v12 = vmax.f32 %v474_v8, 0.0  ;;  %v477_v13 = vmul.f32 %v740_v9, %v475_v7 }
 0x1f7   : > { %v478_v16 = vmul.f32 %v740_v9, %v476_v12 }
 0x1f9   : > { %v479_v17 = vpack.c.bf16 %v478_v16, %v477_v13 }
 0x1fb   : > { %v538_v18 = vmul.bf16 %v479_v17, %v894_v20  ;;  %v487_v19 = vmul.bf16 %v479_v17, %v871_v11  ;;  %v551_v2 = vmul.bf16 %v479_v17, %v901_v23  ;;  %v511_v4 = vmul.bf16 %v479_v17, %v878_v14  ;;  %v787_v14 = vld [vmem:[%s1031_s3 + $0x4] ss:$8 sps:$4 sm:$0xff]   ;;  %v491_v20 = vpop.permute.xlu1 %490 }
 0x1fc   : > { %v575_v10 = vmul.bf16 %v479_v17, %v917_v27  ;;  %v524_v11 = vmul.bf16 %v479_v17, %v880_v15  ;;  %747 = vmatprep.mubr.msk.bf16.mxu1 %vm262_vm2, %v787_v14  ;;  %v598_v15 = vld [vmem:[%s1032_s4 + $0x8] sm:$0xff] }
 0x1fd   : > { %542 = vrot.lane.b32.xlu1 %v538_v18, %s799_s25  ;;  %492 = vrot.lane.b32.xlu0 %v487_v19, %s803_s29 }
 0x201   : > { %555 = vrot.lane.b32.xlu1 %v551_v2, %s800_s26  ;;  %503 = vrot.lane.b32.xlu0 %v479_v17, %s804_s30 }
 0x205   : > { %566 = vrot.lane.b32.xlu1 %v479_v17, %s805_s8  ;;  %516 = vrot.lane.b32.xlu0 %v511_v4, %s802_s28  ;;  %s224_s28 = scalar_lea.vmem %s1033_s5, %s752_s20 }
 0x209   : > { %579 = vrot.lane.b32.xlu1 %v575_v10, %s798_s24  ;;  %529 = vrot.lane.b32.xlu0 %v524_v11, %s801_s27 }
 0x20d   : > { %601 = vperm.xlu1 %780, %v597_v22   ;;  %544 = vrot.lane.b32.xlu0 %v337_v21, %s799_s25  ;;  %v502_v21 = vpop.permute.xlu1 %501 }
 0x211   : > { %557 = vrot.lane.b32.xlu0 %v354_v24, %s800_s26  ;;  %v515_v25 = vpop.permute.xlu1 %514 }
 0x215   : > { %568 = vrot.lane.b32.xlu0 %v796_v1, %s805_s8  ;;  %v528_v30 = vpop.permute.xlu1 %527 }
 0x219   : > { %581 = vrot.lane.b32.xlu0 %v383_v28, %s798_s24 }
 0x21d   : > { %606 = vperm.xlu0 %779, %v598_v15  }
 0x26f   : > { %v493_v23 = vpop.permute.xlu0 %492  ;;  %v543_v33 = vpop.permute.xlu1 %542 }
 0x270   : > { %v494_v24 = vsel %vm278_vm3, %v491_v20, %v493_v23 }
 0x271   : > { %622 = vmatpush1.bf16.msra.mxu1 %v494_v24 }
 0x272   : > { %623 = vmatprep.subr.bf16.mxu1 %v796_v1 }
 0x273   : > { %v504_v26 = vpop.permute.xlu0 %503  ;;  %v556_v35 = vpop.permute.xlu1 %555 }
 0x274   : > { %v505_v29 = vsel %vm290_vm4, %v502_v21, %v504_v26 }
 0x275   : > { %624 = vmatpush1.bf16.msra.mxu1 %v505_v29 }
 0x276   : > { %625 = vmatprep.subr.bf16.mxu1 %v796_v1 }
 0x277   : > { %v517_v27 = vpop.permute.xlu0 %516  ;;  %v567_v40 = vpop.permute.xlu1 %566 }
 0x278   : > { %v518_v28 = vsel %vm308_vm5, %v515_v25, %v517_v27 }
 0x279   : > { %626 = vmatpush1.bf16.msra.mxu1 %v518_v28 }
 0x27a   : > { %627 = vmatprep.subr.bf16.mxu1 %v796_v1 }
 0x27b   : > { %v530_v31 = vpop.permute.xlu0 %529  ;;  %v580_v43 = vpop.permute.xlu1 %579 }
 0x27c   : > { %v531_v32 = vsel %vm325_vm6, %v528_v30, %v530_v31 }
 0x27d   : > { %628 = vmatpush1.bf16.msra.mxu1 %v531_v32 }
 0x27e   : > { %629 = vmatprep.subr.bf16.mxu1 %v796_v1 }
 0x27f   : > { %v545_v34 = vpop.permute.xlu0 %544 }
 0x280   : > { %v546_v37 = vsel %vm344_vm7, %v543_v33, %v545_v34 }
 0x281   : > { %630 = vmatpush1.bf16.msra.mxu1 %v479_v17 }
 0x282   : > { %631 = vmatprep.subr.bf16.mxu1 %v796_v1 }
 0x283   : > { %v558_v36 = vpop.permute.xlu0 %557 }
 0x284   : > { %v559_v39 = vsel %vm361_vm8, %v556_v35, %v558_v36 }
 0x285   : > { %632 = vmatpush1.bf16.msra.mxu1 %v546_v37 }
 0x286   : > { %633 = vmatprep.subr.bf16.mxu1 %v796_v1 }
 0x287   : > { %v569_v38 = vpop.permute.xlu0 %568 }
 0x288   : > { %v570_v41 = vsel %vm373_vm9, %v567_v40, %v569_v38 }
 0x289   : > { %634 = vmatpush1.bf16.msra.mxu1 %v559_v39 }
 0x28a   : > { %635 = vmatprep.subr.bf16.mxu1 %v796_v1 }
 0x28b   : > { %v582_v42 = vpop.permute.xlu0 %581 }
 0x28c   : > { %v583_v44 = vsel %vm390_vm10, %v580_v43, %v582_v42  ;;  %v602_v46 = vpop.permute.xlu1 %601 }
 0x28d   : > { %636 = vmatpush1.bf16.msra.mxu1 %v570_v41 }
 0x28e   : > { %637 = vmatprep.subr.bf16.mxu1 %v796_v1 }
 0x291   : > { %638 = vmatpush1.bf16.msra.mxu1 %v583_v44 }
 0x294   : > { %654 = vmatmul.mubr.bf16.vlgmr.msra.gmra.mrb[0].mxu1 %v785_v45 }
 0x29c   : > { %v607_v50 = vpop.permute.xlu0 %606 }
 0x367   : > { %v655_v47 = vpop.f32.mrb[0].mxu1 }
 0x368   : > { %v656_v48 = vadd.f32 %v655_v47, %v602_v46  ;;  %v657_v49 = vpop.f32.mrb[1].mxu1 }
 0x369   : > { %v658_v51 = vpop.f32.mrb[2].mxu1 }
 0x36a   : > { %v659_v52 = vadd.f32 %v658_v51, %v607_v50  ;;  %v660_v53 = vpop.f32.mrb[3].mxu1  ;;  %v662_v54 = vmax.f32 %v656_v48, 0.0 }
 0x36c   : > { %v663_v1 = vmax.f32 %v659_v52, 0.0 }
 0x36e   : > { %v759_v55 = vpack.c.bf16 %v663_v1, %v662_v54 }
 0x370   : > { %760 = vst [vmem:[%s224_s28] sm:$0xff] %v759_v55  }
 0x371 PF: > { %s15_s18 = sadd.s32 1, %s794_s18  }
 0x372   : > { %p12_p4 = scmp.ge.s32.totalorder %s15_s18, 4  }
 0x374   :  { %14 = sbr.rel (!%p12_p4) target bundleno = 1 (0x1), region = 70 }

// kernel: backbone_forward.6
= control target key start
LH: loop header
LB: loop body
LE: loop exit
PB: predicated region body
PF: predicated region fallthrough
CT: control target
= control target key end

     0   :  { %s1168_s18 = smov 0   ;;  %s1411_s0 = inlined_call_operand.vmem [shape: bf16[2,16,4], index: 0, kind: input, shape index: {}]   ;;  %s1412_s1 = inlined_call_operand.vmem [shape: bf16[32,144], index: 1, kind: input, shape index: {}]   ;;  %s1413_s2 = inlined_call_operand.vmem [shape: f32[32,1], index: 2, kind: input, shape index: {}]   ;;  %s1414_s3 = inlined_call_operand.vmem [shape: bf16[32,288], index: 3, kind: input, shape index: {}]   ;;  %s1415_s4 = inlined_call_operand.vmem [shape: f32[32,1], index: 4, kind: input, shape index: {}]   ;;  %s1416_s5 = inlined_call_operand.vmem [shape: bf16[2,32,128], index: 5, kind: output, shape index: {}]  }
   0x1 LB: > { %s989_s19 = sadd.s32 4294967295, %s1128_s18   ;;  %p993_p0 = scmp.ge.s32.totalorder %s1128_s18, 1  ;;  %s1128_s18 = sphi %s1168_s18, %s15_s18  }
   0x2   : > { %p187_p1 = scmp.lt.s32.totalorder %s1128_s18, 3 }
   0x4   : > { %p188_p2 = pnand %p993_p0, %p187_p1 }
   0x5   : > { %v226_v0 = vlaneseq (!%p188_p2)  ;;  %v1130_v1 = vmov (!%p188_p2), 0   ;;  %p215_p3 = scmp.lt.s32.totalorder (!%p188_p2), %s989_s19, 1  ;;  %v1131_v4 = vmov (!%p188_p2), 0.0   ;;  %vm262_vm2 = vcmask (!%p188_p2), 31744   ;;  %s1132_s24 = smov (!%p188_p2), 125   ;;  %v405_v30 = vld [vmem:[%s1413_s2] sm:$0xff] (!%p188_p2) }
   0x6   : > { %191 = sbr.rel (%p188_p2) target bundleno = 898 (0x382), region = 40  ;;  %252 = vst [vmem:[#allocation2 + $0x8] sm:$0xff] (!%p188_p2), %v1130_v1  ;;  %1096 = vset.pattern.permute.xlu1 (!%p188_p2), %v1130_v1  ;;  %1095 = vset.pattern.permute.xlu0 (!%p188_p2), %v1130_v1  ;;  %s1133_s25 = smov (!%p188_p2), 127   ;;  %v1110_v26 = vld [vmem:[%s1412_s1 + $0x4] ss:$8 sps:$4 sm:$0xff] (!%p188_p2)   ;;  %vm447_vm3 = vcmask (!%p188_p2), 130048  }
   0x7   : > { %v1179_v2 = vand.u32 (!%p188_p2), 127, %v226_v0  ;;  %454 = vmatprep.subr.bf16.mxu0 (!%p188_p2), %v1130_v1  ;;  %s1134_s26 = smov (!%p188_p2), 1   ;;  %s1135_s27 = smov (!%p188_p2), 3   ;;  %1006 = vmatprep.mubr.msk.bf16.mxu0 (!%p188_p2), %vm447_vm3, %v1110_v26  ;;  %v406_v31 = vld [vmem:[%s1413_s2 + $0x8] sm:$0xff] (!%p188_p2)  ;;  %v408_v32 = vld [vmem:[%s1413_s2 + $0x18] sm:$0xff] (!%p188_p2)  ;;  %v407_v33 = vld [vmem:[%s1413_s2 + $0x10] sm:$0xff] (!%p188_p2) }
   0x8   : > { %s1136_s28 = smov (!%p188_p2), 2   ;;  %s1137_s6 = smov (!%p188_p2), 126   ;;  %vm278_vm4 = vcmask (!%p188_p2), 23552   ;;  %vm290_vm5 = vcmask (!%p188_p2), 15360   ;;  %vm308_vm6 = vcmask (!%p188_p2), 7168   ;;  %vm343_vm7 = vcmask (!%p188_p2), 1039360  }
   0x9   : > { %v232_v3 = vand.u32 (!%p188_p2), 1, %v1179_v2  ;;  %vm371_vm8 = vcmask (!%p188_p2), 1031168   ;;  %vm388_vm9 = vcmask (!%p188_p2), 1022976   ;;  %v1108_v58 = vld [vmem:[%s1412_s1] ss:$8 sps:$4 sm:$0xff] (!%p188_p2)   ;;  %vm248_vm10 = vcmp.lt.s32.totalorder (!%p188_p2), %v1179_v2, 4 }
   0xa   : > { %v1111_v59 = vld [vmem:[%s1412_s1 + $0x14] ss:$8 sps:$4 sm:$0xff] (!%p188_p2)   ;;  %v1113_v60 = vld [vmem:[%s1412_s1 + $0x10] ss:$8 sps:$4 sm:$0xff] (!%p188_p2)   ;;  %vm805_vm11 = vcmask (!%p188_p2), 261120  }
   0xb   : > { %vm240_vm0 = vcmp.ne.s32.totalorder (!%p188_p2), %v232_v3, 0  ;;  %vm244_vm1 = vcmp.ne.s32.totalorder (!%p188_p2), %v232_v3, 1 }
   0xc   : > { %v998_v5 = vsel (!%p188_p2), %vm240_vm0, 1.0, %v1131_v4  ;;  %v999_v6 = vsel (!%p188_p2), %vm244_vm1, 1.0, %v1131_v4 }
   0xd   : > { %s1418_s19 = smov (!%p215_p3, %s989_s19), 1  ;;  %v243_v7 = vpack.c.bf16 %v998_v5, %v998_v5  ;;  %v247_v9 = vpack.c.bf16 %v999_v6, %v999_v6 }
   0xe   : > { %s1022_s20 = sshll.u32 %s1418_s19, 3 }
   0xf   : > { %s219_s23 = scalar_lea.vmem %s1411_s0, %s1022_s20  ;;  %267 = vrot.lane.b32.xlu0 %v243_v7, %s1132_s24  ;;  %314 = vrot.lane.b32.xlu1 %v243_v7, %s1133_s25  ;;  %s1023_s20 = sshll.u32 %s1418_s19, 4 }
  0x10   : > { %v1107_v8 = vld [vmem:[%s219_s23] sm:$0xff]   ;;  %s224_s23 = scalar_lea.vmem %s1416_s5, %s1023_s20 }
  0x11   : > { %263 = vst.msk [vmem:[#allocation2 + $0x8] sm:$0xff] %vm262_vm2, %v1107_v8 }
  0x13   : > { %297 = vrot.lane.b32.xlu0 %v247_v9, %s1133_s25  ;;  %332 = vrot.lane.b32.xlu1 %v247_v9, %s1134_s26 }
  0x17   : > { %349 = vrot.lane.b32.xlu0 %v243_v7, %s1134_s26  ;;  %377 = vrot.lane.b32.xlu1 %v247_v9, %s1135_s27  ;;  %v1000_v9 = vsel %vm248_vm10, 1.0, %v1131_v4 }
  0x18   : > { %v1197_v10 = vld [vmem:[#allocation2 + $0x8] sm:$0xff] }
  0x81   : > { %v1199_v11 = vpop.permute.xlu0 %267  ;;  %v1208_v15 = vpop.permute.xlu1 %314 }
  0x82   : > { %v270_v12 = vmul.bf16 0, %v1199_v11  ;;  %v271_v13 = vmul.bf16 %v1199_v11, %v1197_v10  ;;  %v1223_v18 = vmul.bf16 0, %v1208_v15  ;;  %v318_v19 = vmul.bf16 %v1208_v15, %v1197_v10 }
  0x84   : > { %274 = vrot.lane.b32.xlu0 %v270_v12, %s1135_s27  ;;  %276 = vrot.lane.b32.xlu1 %v271_v13, %s1135_s27 }
  0x85   : > { %v1206_v14 = vpop.permute.xlu0 %297  ;;  %v1227_v20 = vpop.permute.xlu1 %332 }
  0x86   : > { %v1215_v16 = vmul.bf16 0, %v1206_v14  ;;  %v301_v17 = vmul.bf16 %v1206_v14, %v1197_v10  ;;  %v335_v21 = vmul.bf16 %v1227_v20, %v1197_v10  ;;  %v336_v22 = vmul.bf16 0, %v1227_v20 }
  0x88   : > { %286 = vrot.lane.b32.xlu0 %v1130_v1, %s1136_s28  ;;  %288 = vrot.lane.b32.xlu1 %v1197_v10, %s1136_s28 }
  0x89   : > { %v1235_v23 = vpop.permute.xlu0 %349  ;;  %v1250_v27 = vpop.permute.xlu1 %377 }
  0x8a   : > { %v352_v24 = vmul.bf16 %v1235_v23, %v1197_v10  ;;  %v1242_v25 = vmul.bf16 0, %v1235_v23  ;;  %v380_v28 = vmul.bf16 %v1250_v27, %v1197_v10  ;;  %v1260_v29 = vmul.bf16 0, %v1250_v27 }
  0x8c   : > { %304 = vrot.lane.b32.xlu0 %v1215_v16, %s1134_s26  ;;  %306 = vrot.lane.b32.xlu1 %v301_v17, %s1134_s26 }
  0x90   : > { %321 = vrot.lane.b32.xlu0 %v1223_v18, %s1134_s26  ;;  %323 = vrot.lane.b32.xlu1 %v318_v19, %s1134_s26 }
  0x94   : > { %339 = vrot.lane.b32.xlu0 %v335_v21, %s1133_s25  ;;  %341 = vrot.lane.b32.xlu1 %v336_v22, %s1133_s25 }
  0x98   : > { %356 = vrot.lane.b32.xlu0 %v352_v24, %s1133_s25  ;;  %358 = vrot.lane.b32.xlu1 %v1242_v25, %s1133_s25 }
  0x9c   : > { %367 = vrot.lane.b32.xlu0 %v1197_v10, %s1137_s6  ;;  %369 = vrot.lane.b32.xlu1 %v1130_v1, %s1137_s6 }
  0xa0   : > { %384 = vrot.lane.b32.xlu0 %v380_v28, %s1132_s24  ;;  %386 = vrot.lane.b32.xlu1 %v1260_v29, %s1132_s24 }
  0xa4   : > { %411 = vperm.xlu0 %1095, %v405_v30   ;;  %416 = vperm.xlu1 %1096, %v406_v31  }
  0xa8   : > { %426 = vperm.xlu0 %1095, %v408_v32   ;;  %421 = vperm.xlu1 %1096, %v407_v33  }
  0xac   : > { %639 = vrot.lane.b32.xlu0 %v336_v22, %s1133_s25  ;;  %1098 = vrot.lane.b32.xlu1 %v1130_v1, %s1136_s28 }
  0xb0   : > { %643 = vrot.lane.b32.xlu0 %v336_v22, %s1133_s25  ;;  %533 = vrot.lane.b32.xlu1 %v270_v12, %s1135_s27 }
  0xb4   : > { %581 = vrot.lane.b32.xlu0 %v1215_v16, %s1134_s26  ;;  %537 = vrot.lane.b32.xlu1 %v270_v12, %s1135_s27 }
  0xb8   : > { %665 = vrot.lane.b32.xlu1 %v1242_v25, %s1133_s25 }
  0xf6   : > { %v275_v34 = vpop.permute.xlu0 %274  ;;  %v277_v35 = vpop.permute.xlu1 %276 }
  0xf7   : > { %v279_v36 = vsel %vm278_vm4, %v275_v34, %v277_v35 }
  0xf8   : > { %455 = vmatpush1.bf16.msra.mxu0 %v279_v36 }
  0xf9   : > { %456 = vmatprep.subr.bf16.mxu0 %v1130_v1 }
  0xfa   : > { %v287_v37 = vpop.permute.xlu0 %286  ;;  %v289_v38 = vpop.permute.xlu1 %288 }
  0xfb   : > { %v291_v39 = vsel %vm290_vm5, %v287_v37, %v289_v38 }
  0xfc   : > { %457 = vmatpush1.bf16.msra.mxu0 %v291_v39 }
  0xfd   : > { %458 = vmatprep.subr.bf16.mxu0 %v1130_v1 }
  0xfe   : > { %v305_v40 = vpop.permute.xlu0 %304  ;;  %v307_v41 = vpop.permute.xlu1 %306 }
  0xff   : > { %v309_v42 = vsel %vm308_vm6, %v305_v40, %v307_v41 }
 0x100   : > { %459 = vmatpush1.bf16.msra.mxu0 %v309_v42 }
 0x101   : > { %460 = vmatprep.subr.bf16.mxu0 %v1130_v1 }
 0x102   : > { %v322_v43 = vpop.permute.xlu0 %321  ;;  %v324_v44 = vpop.permute.xlu1 %323 }
 0x103   : > { %v325_v45 = vsel %vm308_vm6, %v322_v43, %v324_v44 }
 0x104   : > { %461 = vmatpush1.bf16.msra.mxu0 %v325_v45 }
 0x105   : > { %462 = vmatprep.subr.bf16.mxu0 %v1130_v1 }
 0x106   : > { %v340_v46 = vpop.permute.xlu0 %339  ;;  %v342_v47 = vpop.permute.xlu1 %341 }
 0x107   : > { %v344_v48 = vsel %vm343_vm7, %v340_v46, %v342_v47 }
 0x108   : > { %463 = vmatpush1.bf16.msra.mxu0 %v1197_v10 }
 0x109   : > { %464 = vmatprep.subr.bf16.mxu0 %v1130_v1 }
 0x10a   : > { %v357_v49 = vpop.permute.xlu0 %356  ;;  %v359_v50 = vpop.permute.xlu1 %358 }
 0x10b   : > { %v360_v51 = vsel %vm343_vm7, %v357_v49, %v359_v50 }
 0x10c   : > { %465 = vmatpush1.bf16.msra.mxu0 %v344_v48 }
 0x10d   : > { %466 = vmatprep.subr.bf16.mxu0 %v1130_v1 }
 0x10e   : > { %v368_v52 = vpop.permute.xlu0 %367  ;;  %v370_v53 = vpop.permute.xlu1 %369 }
 0x10f   : > { %v372_v54 = vsel %vm371_vm8, %v368_v52, %v370_v53 }
 0x110   : > { %467 = vmatpush1.bf16.msra.mxu0 %v360_v51 }
 0x111   : > { %468 = vmatprep.subr.bf16.mxu0 %v1130_v1 }
 0x112   : > { %v385_v55 = vpop.permute.xlu0 %384  ;;  %v387_v56 = vpop.permute.xlu1 %386 }
 0x113   : > { %v389_v57 = vsel %vm388_vm9, %v385_v55, %v387_v56 }
 0x114   : > { %469 = vmatpush1.bf16.msra.mxu0 %v372_v54 }
 0x115   : > { %470 = vmatprep.subr.bf16.mxu0 %v1130_v1 }
 0x118   : > { %471 = vmatpush1.bf16.msra.mxu0 %v389_v57 }
 0x11b   : > { %487 = vmatmul.mubr.bf16.vlgmr.msra.gmra.mrb[0].mxu0 %v1108_v58 }
 0x11c   : > { %1007 = vmatprep.mubr.msk.bf16.mxu0 %vm447_vm3, %v1111_v59 }
 0x123   : > { %495 = vmatmul.mubr.bf16.gmra.mrb[4].mxu0 %v1113_v60  ;;  %v412_v61 = vpop.permute.xlu0 %411  ;;  %v417_v3 = vpop.permute.xlu1 %416 }
 0x127   : > { %v422_v17 = vpop.permute.xlu1 %421  ;;  %v427_v26 = vpop.permute.xlu0 %426 }
 0x12b   : > { %v1099_v42 = vpop.permute.xlu1 %1098  ;;  %v640_v43 = vpop.permute.xlu0 %639 }
 0x12c   : > { %v1100_v59 = vunpack.i.l.bf16 %v1099_v42 }
 0x12f   : > { %v534_v44 = vpop.permute.xlu1 %533 }
 0x133   : > { %v538_v45 = vpop.permute.xlu1 %537 }
 0x137   : > { %v666_v47 = vpop.permute.xlu1 %665 }
 0x1ee   : > { %v488_v62 = vpop.f32.mrb[0].mxu0 }
 0x1ef   : > { %v489_v63 = vadd.f32 %v488_v62, %v412_v61  ;;  %v490_v0 = vpop.f32.mrb[1].mxu0 }
 0x1f0   : > { %v491_v5 = vpop.f32.mrb[2].mxu0  ;;  %v1101_v0 = vunpack.i.h.bf16 %v1099_v42 }
 0x1f1   : > { %v503_v6 = vmax.f32 %v489_v63, 0.0  ;;  %v492_v7 = vadd.f32 %v491_v5, %v417_v3  ;;  %v493_v8 = vpop.f32.mrb[3].mxu0 }
 0x1f3   : > { %v504_v10 = vmax.f32 %v492_v7, 0.0  ;;  %v507_v12 = vmul.f32 %v1000_v9, %v503_v6 }
 0x1f5   : > { %v508_v13 = vmul.f32 %v1000_v9, %v504_v10 }
 0x1f6   : > { %v496_v19 = vpop.f32.mrb[4].mxu0 }
 0x1f7   : > { %v511_v21 = vpack.c.bf16 %v508_v13, %v507_v12  ;;  %v497_v22 = vadd.f32 %v496_v19, %v422_v17  ;;  %v498_v24 = vpop.f32.mrb[5].mxu0 }
 0x1f8   : > { %v499_v28 = vpop.f32.mrb[6].mxu0 }
 0x1f9   : > { %v505_v2 = vmax.f32 %v497_v22, 0.0  ;;  %v500_v30 = vadd.f32 %v499_v28, %v427_v26  ;;  %v501_v31 = vpop.f32.mrb[7].mxu0  ;;  %557 = vrot.lane.b32.xlu0 %v511_v21, %s1136_s28  ;;  %1039 = vmatprep.subr.bf16.mxu1 %v511_v21  ;;  %v629_v32 = vmul.bf16 %v511_v21, %v1227_v20  ;;  %v526_v4 = vmul.bf16 %v511_v21, %v1199_v11 }
 0x1fa   : > { %v574_v36 = vmul.bf16 %v511_v21, %v1206_v14  ;;  %v655_v38 = vmul.bf16 %v511_v21, %v1235_v23 }
 0x1fb   : > { %v506_v33 = vmax.f32 %v500_v30, 0.0  ;;  %637 = vrot.lane.b32.xlu1 %v629_v32, %s1133_s25  ;;  %v509_v34 = vmul.f32 %v1000_v9, %v505_v2 }
 0x1fd   : > { %v510_v35 = vmul.f32 %v1000_v9, %v506_v33  ;;  %535 = vrot.lane.b32.xlu0 %v526_v4, %s1135_s27  ;;  %v1114_v33 = vld [vmem:[%s1414_s3] ss:$12 sps:$4 sm:$0xff]  }
 0x1ff   : > { %v512_v37 = vpack.c.bf16 %v510_v35, %v509_v34  ;;  %583 = vrot.lane.b32.xlu1 %v574_v36, %s1134_s26  ;;  %v1117_v34 = vld [vmem:[%s1414_s3 + $0x1c] ss:$12 sps:$4 sm:$0xff]  }
 0x201   : > { %663 = vrot.lane.b32.xlu0 %v655_v38, %s1133_s25  ;;  %v528_v39 = vmul.bf16 %v512_v37, %v1199_v11  ;;  %v631_v40 = vmul.bf16 %v512_v37, %v1227_v20  ;;  %v657_v41 = vmul.bf16 %v512_v37, %v1235_v23  ;;  %v576_v11 = vmul.bf16 %v512_v37, %v1206_v14  ;;  %v1116_v20 = vld [vmem:[%s1414_s3 + $0x4] ss:$12 sps:$4 sm:$0xff]  }
 0x202   : > { %844 = vmatprep.mubr.bf16.mxu1 %v1116_v20  ;;  %v703_v14 = vmul.bf16 %v511_v21, %v1250_v27  ;;  %v705_v23 = vmul.bf16 %v512_v37, %v1250_v27  ;;  %v754_v27 = vld [vmem:[%s1415_s4 + $0x18] sm:$0xff] }
 0x203   : > { %561 = vrot.lane.b32.xlu1 %v512_v37, %s1136_s28 }
 0x205   : > { %539 = vrot.lane.b32.xlu0 %v528_v39, %s1135_s27 }
 0x207   : > { %641 = vrot.lane.b32.xlu1 %v631_v40, %s1133_s25  ;;  %v1119_v40 = vld [vmem:[%s1414_s3 + $0x18] ss:$12 sps:$4 sm:$0xff]  }
 0x209   : > { %585 = vrot.lane.b32.xlu0 %v1215_v16, %s1134_s26  ;;  %v600_v16 = vmul.bf16 %v511_v21, %v1208_v15 }
 0x20b   : > { %669 = vrot.lane.b32.xlu1 %v1242_v25, %s1133_s25  ;;  %v751_v25 = vld [vmem:[%s1415_s4] sm:$0xff] }
 0x20d   : > { %685 = vrot.lane.b32.xlu0 %v511_v21, %s1137_s6 }
 0x20f   : > { %1103 = vrot.lane.b32.xlu1 %v1130_v1, %s1137_s6  ;;  %v602_v1 = vmul.bf16 %v512_v37, %v1208_v15  ;;  %v752_v15 = vld [vmem:[%s1415_s4 + $0x8] sm:$0xff] }
 0x211   : > { %667 = vrot.lane.b32.xlu0 %v657_v41, %s1133_s25  ;;  %v1120_v41 = vld [vmem:[%s1414_s3 + $0x8] ss:$12 sps:$4 sm:$0xff]  }
 0x213   : > { %587 = vrot.lane.b32.xlu1 %v576_v11, %s1134_s26  ;;  %v1121_v11 = vld [vmem:[%s1414_s3 + $0x20] ss:$12 sps:$4 sm:$0xff]  }
 0x215   : > { %607 = vrot.lane.b32.xlu0 %v1223_v18, %s1134_s26 }
 0x217   : > { %609 = vrot.lane.b32.xlu1 %v600_v16, %s1134_s26 }
 0x219   : > { %689 = vrot.lane.b32.xlu0 %v512_v37, %s1137_s6 }
 0x21b   : > { %611 = vrot.lane.b32.xlu1 %v1223_v18, %s1134_s26  ;;  %v753_v18 = vld [vmem:[%s1415_s4 + $0x10] sm:$0xff] }
 0x21d   : > { %613 = vrot.lane.b32.xlu0 %v602_v1, %s1134_s26 }
 0x21f   : > { %711 = vrot.lane.b32.xlu1 %v703_v14, %s1132_s24 }
 0x221   : > { %713 = vrot.lane.b32.xlu0 %v1260_v29, %s1132_s24 }
 0x223   : > { %715 = vrot.lane.b32.xlu1 %v705_v23, %s1132_s24 }
 0x225   : > { %717 = vrot.lane.b32.xlu0 %v1260_v29, %s1132_s24  ;;  %v644_v29 = vpop.permute.xlu0 %643 }
 0x227   : > { %757 = vperm.xlu1 %1096, %v751_v25  }
 0x229   : > { %762 = vperm.xlu0 %1095, %v752_v15   ;;  %v582_v46 = vpop.permute.xlu0 %581 }
 0x22b   : > { %767 = vperm.xlu1 %1096, %v753_v18  }
 0x22d   : > { %772 = vperm.xlu0 %1095, %v754_v27  }
 0x26b   : > { %v558_v48 = vpop.permute.xlu0 %557 }
 0x26c   : > { %v563_v61 = vsel %vm290_vm5, %v1100_v59, %v558_v48 }
 0x26d   : > { %v638_v49 = vpop.permute.xlu1 %637 }
 0x26e   : > { %v645_v58 = vsel %vm343_vm7, %v638_v49, %v640_v43 }
 0x26f   : > { %v536_v50 = vpop.permute.xlu0 %535 }
 0x270   : > { %v541_v51 = vsel %vm278_vm4, %v534_v44, %v536_v50 }
 0x271   : > { %1040 = vmatpush3.bf16.msra.mxu1 %v541_v51  ;;  %v584_v52 = vpop.permute.xlu1 %583 }
 0x272   : > { %1041 = vmatprep.subr.bf16.mxu1 %v512_v37  ;;  %v589_v9 = vsel %vm308_vm6, %v582_v46, %v584_v52 }
 0x273   : > { %v664_v53 = vpop.permute.xlu0 %663 }
 0x274   : > { %v671_v7 = vsel %vm343_vm7, %v664_v53, %v666_v47 }
 0x275   : > { %v562_v54 = vpop.permute.xlu1 %561 }
 0x276   : > { %v564_v5 = vsel %vm290_vm5, %v1101_v0, %v562_v54 }
 0x277   : > { %v540_v55 = vpop.permute.xlu0 %539 }
 0x278   : > { %v542_v56 = vsel %vm278_vm4, %v538_v45, %v540_v55 }
 0x279   : > { %1042 = vmatpush3.bf16.msra.mxu1 %v542_v56  ;;  %v642_v57 = vpop.permute.xlu1 %641 }
 0x27a   : > { %1043 = vmatprep.subr.bf16.mxu1 %v645_v58  ;;  %v646_v63 = vsel %vm343_vm7, %v642_v57, %v644_v29 }
 0x27b   : > { %v586_v60 = vpop.permute.xlu0 %585 }
 0x27d   : > { %v670_v62 = vpop.permute.xlu1 %669  ;;  %1044 = vmatpush3.bf16.msra.mxu1 %v563_v61 }
 0x27e   : > { %1045 = vmatprep.subr.bf16.mxu1 %v646_v63 }
 0x27f   : > { %v686_v3 = vpop.permute.xlu0 %685 }
 0x281   : > { %v1104_v6 = vpop.permute.xlu1 %1103  ;;  %1046 = vmatpush3.bf16.msra.mxu1 %v564_v5 }
 0x282   : > { %1047 = vmatprep.subr.bf16.mxu1 %v671_v7  ;;  %v1105_v12 = vunpack.i.l.bf16 %v1104_v6  ;;  %v1106_v24 = vunpack.i.h.bf16 %v1104_v6 }
 0x283   : > { %v668_v8 = vpop.permute.xlu0 %667 }
 0x284   : > { %v672_v10 = vsel %vm343_vm7, %v668_v8, %v670_v62  ;;  %v693_v22 = vsel %vm371_vm8, %v686_v3, %v1105_v12 }
 0x285   : > { %v588_v13 = vpop.permute.xlu1 %587  ;;  %1048 = vmatpush3.bf16.msra.mxu1 %v589_v9 }
 0x286   : > { %1049 = vmatprep.subr.bf16.mxu1 %v672_v10  ;;  %v590_v19 = vsel %vm308_vm6, %v586_v60, %v588_v13 }
 0x287   : > { %v608_v17 = vpop.permute.xlu0 %607 }
 0x289   : > { %v610_v21 = vpop.permute.xlu1 %609  ;;  %1050 = vmatpush3.bf16.msra.mxu1 %v590_v19 }
 0x28a   : > { %1051 = vmatprep.subr.bf16.mxu1 %v693_v22  ;;  %v615_v28 = vsel %vm308_vm6, %v608_v17, %v610_v21 }
 0x28b   : > { %v690_v26 = vpop.permute.xlu0 %689 }
 0x28c   : > { %v694_v2 = vsel %vm371_vm8, %v690_v26, %v1106_v24 }
 0x28d   : > { %v612_v30 = vpop.permute.xlu1 %611  ;;  %1052 = vmatpush3.bf16.msra.mxu1 %v615_v28 }
 0x28e   : > { %1053 = vmatprep.subr.bf16.mxu1 %v694_v2 }
 0x28f   : > { %v614_v31 = vpop.permute.xlu0 %613 }
 0x290   : > { %v616_v32 = vsel %vm308_vm6, %v612_v30, %v614_v31 }
 0x291   : > { %v712_v4 = vpop.permute.xlu1 %711  ;;  %1054 = vmatpush3.bf16.msra.mxu1 %v616_v32 }
 0x293   : > { %v714_v35 = vpop.permute.xlu0 %713 }
 0x294   : > { %845 = vmatmul.mubr.bf16.vlgmr.msra.gmra.mrb[0].mxu1 %v1114_v33  ;;  %v719_v36 = vsel %vm388_vm9, %v712_v4, %v714_v35 }
 0x295   : > { %1071 = vmatprep.subr.bf16.mxu1 %v719_v36  ;;  %852 = vmatprep.mubr.bf16.mxu1 %v1117_v34  ;;  %v716_v37 = vpop.permute.xlu1 %715 }
 0x296   : > { %1072 = vmatpush3.bf16.msra.mxu1 %v719_v36 }
 0x297   : > { %v718_v38 = vpop.permute.xlu0 %717 }
 0x298   : > { %v720_v39 = vsel %vm388_vm9, %v716_v37, %v718_v38 }
 0x299   : > { %1073 = vmatprep.subr.bf16.mxu1 %v720_v39 }
 0x29a   : > { %1074 = vmatpush3.bf16.msra.mxu1 %v720_v39 }
 0x29c   : > { %853 = vmatmul.mubr.bf16.gmra.mrb[4].mxu1 %v1119_v40 }
 0x29d   : > { %1075 = vmatprep.mubr.msk.bf16.mxu1 %vm805_vm11, %v1120_v41 }
 0x2a4   : > { %1076 = vmatmul.mubr.msk.bf16.vlgmr.msra.gmra.mrb[8].mxu1 %vm805_vm11, %v1121_v11 }
 0x2a6   : > { %v758_v15 = vpop.permute.xlu1 %757 }
 0x2a8   : > { %v763_v42 = vpop.permute.xlu0 %762 }
 0x2aa   : > { %v768_v46 = vpop.permute.xlu1 %767 }
 0x2ac   : > { %v773_v48 = vpop.permute.xlu0 %772 }
 0x367   : > { %v1055_v20 = vpop.f32.mrb[0].mxu1 }
 0x368   : > { %v1056_v16 = vpop.f32.mrb[1].mxu1 }
 0x369   : > { %v1057_v1 = vadd.f32 %v1056_v16, %v1055_v20  ;;  %v1058_v14 = vpop.f32.mrb[2].mxu1 }
 0x36a   : > { %v1059_v23 = vpop.f32.mrb[3].mxu1 }
 0x36b   : > { %v1060_v25 = vadd.f32 %v1059_v23, %v1058_v14  ;;  %v847_v50 = vadd.f32 %v1057_v1, %v758_v15 }
 0x36d   : > { %v850_v56 = vadd.f32 %v1060_v25, %v763_v42 }
 0x36f   : > { %v1061_v18 = vpop.f32.mrb[4].mxu1 }
 0x370   : > { %v1062_v27 = vpop.f32.mrb[5].mxu1 }
 0x371   : > { %v1063_v43 = vadd.f32 %v1062_v27, %v1061_v18  ;;  %v1064_v44 = vpop.f32.mrb[6].mxu1 }
 0x372   : > { %v1065_v29 = vpop.f32.mrb[7].mxu1 }
 0x373   : > { %v1066_v45 = vadd.f32 %v1065_v29, %v1064_v44  ;;  %v855_v47 = vadd.f32 %v1063_v43, %v768_v46 }
 0x375   : > { %v858_v53 = vadd.f32 %v1066_v45, %v773_v48 }
 0x377   : > { %v1077_v49 = vpop.f32.mrb[8].mxu1 }
 0x378   : > { %v904_v51 = vadd.f32 %v1077_v49, %v855_v47  ;;  %v895_v52 = vpop.f32.mrb[9].mxu1 }
 0x379   : > { %v896_v54 = vadd.f32 %v895_v52, %v847_v50  ;;  %v1078_v55 = vpop.f32.mrb[10].mxu1 }
 0x37a   : > { %v907_v57 = vadd.f32 %v1078_v55, %v858_v53  ;;  %v898_v58 = vpop.f32.mrb[11].mxu1  ;;  %v912_v60 = vmax.f32 %v904_v51, 0.0 }
 0x37b   : > { %v899_v59 = vadd.f32 %v898_v58, %v850_v56  ;;  %v910_v62 = vmax.f32 %v896_v54, 0.0 }
 0x37c   : > { %v913_v61 = vmax.f32 %v907_v57, 0.0 }
 0x37d   : > { %v911_v63 = vmax.f32 %v899_v59, 0.0 }
 0x37e   : > { %v1036_v0 = vpack.c.bf16 %v913_v61, %v912_v60 }
 0x37f   : > { %v1031_v3 = vpack.c.bf16 %v911_v63, %v910_v62 }
 0x380   : > { %1038 = vst [vmem:[%s224_s23 + $0x8] sm:$0xff] %v1036_v0  }
 0x381   : > { %1032 = vst [vmem:[%s224_s23] sm:$0xff] %v1031_v3  }
 0x382 PF: > { %s15_s18 = sadd.s32 1, %s1128_s18  }
 0x383   : > { %p12_p4 = scmp.ge.s32.totalorder %s15_s18, 4  }
 0x385   :  { %14 = sbr.rel (!%p12_p4) target bundleno = 1 (0x1), region = 70 }

// kernel: backbone_forward.7
= control target key start
LH: loop header
LB: loop body
LE: loop exit
PB: predicated region body
PF: predicated region fallthrough
CT: control target
= control target key end

     0   :  { %s726_s15 = smov 0   ;;  %s836_s0 = inlined_call_operand.vmem [shape: f32[2,20,128], index: 0, kind: input, shape index: {}]   ;;  %s837_s1 = inlined_call_operand.vmem [shape: bf16[2,4,16,128], index: 1, kind: input, shape index: {}]   ;;  %s838_s2 = inlined_call_operand.vmem [shape: bf16[2,4,16,128], index: 2, kind: input, shape index: {}]   ;;  %s839_s3 = inlined_call_operand.vmem [shape: bf16[2,4,32,128], index: 3, kind: input, shape index: {}]   ;;  %s840_s4 = inlined_call_operand.vmem [shape: f32[2,64,128], index: 4, kind: output, shape index: {}]  }
   0x1 LB: > { %s563_s16 = sadd.s32 4294967295, %s699_s15   ;;  %p567_p0 = scmp.ge.s32.totalorder %s699_s15, 1  ;;  %s699_s15 = sphi %s726_s15, %s14_s15  }
   0x2   : > { %p192_p1 = scmp.lt.s32.totalorder %s699_s15, 3 }
   0x4   : > { %p193_p2 = pnand %p567_p0, %p192_p1 }
   0x5   : > { %p233_p3 = scmp.lt.s32.totalorder (!%p193_p2), %s563_s16, 1  ;;  %v279_v0 = vlaneseq (!%p193_p2) }
   0x6   : > { %196 = sbr.rel (%p193_p2) target bundleno = 54 (0x36), region = 36 }
   0x7   : > { %v736_v1 = vshrl.u32 (!%p193_p2), %v279_v0, 7 }
   0x9   : > { %v741_v2 = vsub.s32 (!%p193_p2), 0, %v736_v1  ;;  %v292_v3 = vsub.s32 (!%p193_p2), 1, %v736_v1  ;;  %v305_v4 = vsub.s32 (!%p193_p2), 2, %v736_v1  ;;  %v318_v5 = vsub.s32 (!%p193_p2), 3, %v736_v1 }
   0xa   : > { %v338_v6 = vsub.s32 (!%p193_p2), 4, %v736_v1  ;;  %v349_v10 = vsub.s32 (!%p193_p2), 5, %v736_v1  ;;  %v362_v11 = vsub.s32 (!%p193_p2), 6, %v736_v1  ;;  %v375_v12 = vsub.s32 (!%p193_p2), 7, %v736_v1 }
   0xd   : > { %s842_s16 = smov (!%p233_p3, %s563_s16), 1 }
   0xe   : > { %s684_s17 = smul.u32 24, %s842_s16  ;;  %s603_s18 = sshll.u32 %s842_s16, 5 }
   0xf   : > { %s242_s21 = scalar_lea.vmem %s837_s1, %s603_s18  ;;  %s761_s27 = scalar_lea.vmem %s838_s2, %s603_s18 }
  0x10   : > { %s237_s24 = scalar_lea.vmem %s836_s0, %s684_s17  ;;  %v608_v7 = vld [vmem:[%s242_s21] sm:$0xff]   ;;  %v671_v8 = vld [vmem:[%s242_s21 + $0x8] sm:$0xff]   ;;  %v672_v9 = vld [vmem:[%s242_s21 + $0x10] sm:$0xff]   ;;  %s605_s28 = sshll.u32 %s842_s16, 6 }
  0x11   : > { %v258_v13 = vld [vmem:[%s237_s24] sm:$0xff]  ;;  %v259_v14 = vld [vmem:[%s237_s24 + $0x8] sm:$0xff]  ;;  %v756_v15 = vld [vmem:[%s237_s24 + $0x10] sm:$0xf]  ;;  %v609_v16 = vunpack.c.l.bf16 %v608_v7  ;;  %v613_v17 = vunpack.c.l.bf16 %v671_v8  ;;  %v617_v18 = vunpack.c.l.bf16 %v672_v9  ;;  %v610_v19 = vunpack.c.h.bf16 %v608_v7  ;;  %s783_s5 = scalar_lea.vmem %s839_s3, %s605_s28  ;;  %s796_s8 = scalar_lea.vmem %s840_s4, %s605_s28 }
  0x12   : > { %v262_v20 = vrot.slane %v258_v13, 4  ;;  %v282_v21 = vrot.slane %v259_v14, %v741_v2  ;;  %v293_v22 = vrot.slane %v259_v14, %v292_v3  ;;  %v306_v23 = vrot.slane %v259_v14, %v305_v4  ;;  %v673_v24 = vld [vmem:[%s242_s21 + $0x18] sm:$0xff]   ;;  %v624_v33 = vld [vmem:[%s761_s27] sm:$0xff]   ;;  %v674_v38 = vld [vmem:[%s761_s27 + $0x8] sm:$0xff]  }
  0x13   : > { %v621_v25 = vunpack.c.l.bf16 %v673_v24  ;;  %v319_v26 = vrot.slane %v259_v14, %v318_v5  ;;  %v765_v27 = vrot.slane %v756_v15, %v292_v3  ;;  %v768_v28 = vrot.slane %v756_v15, %v305_v4  ;;  %v675_v47 = vld [vmem:[%s761_s27 + $0x10] sm:$0xff]   ;;  %v676_v52 = vld [vmem:[%s761_s27 + $0x18] sm:$0xff]  }
  0x14   : > { %v264_v29 = vmul.f32 %v262_v20, %v258_v13  ;;  %v283_v30 = vmul.f32 %v609_v16, %v282_v21  ;;  %v294_v31 = vmul.f32 %v613_v17, %v293_v22  ;;  %v307_v32 = vmul.f32 %v617_v18, %v306_v23 }
  0x15   : > { %v320_v34 = vmul.f32 %v621_v25, %v319_v26  ;;  %v772_v35 = vrot.slane %v756_v15, %v318_v5  ;;  %v284_v36 = vmul.f32 %v610_v19, %v282_v21  ;;  %v614_v37 = vunpack.c.h.bf16 %v671_v8  ;;  %v680_v19 = vld [vmem:[%s783_s5 + $0x20] sm:$0xff]  }
  0x16   : > { %v266_v39 = vrot.slane %v264_v29, 1  ;;  %v269_v40 = vrot.slane %v264_v29, 2  ;;  %v272_v41 = vrot.slane %v264_v29, 3  ;;  %v296_v42 = vadd.f32 %v294_v31, %v283_v30 }
  0x17   : > { %v295_v43 = vmul.f32 %v614_v37, %v293_v22  ;;  %v618_v44 = vunpack.c.h.bf16 %v672_v9  ;;  %v622_v45 = vunpack.c.h.bf16 %v673_v24  ;;  %v625_v46 = vunpack.c.l.bf16 %v624_v33  ;;  %v682_v22 = vld [vmem:[%s783_s5 + $0x30] sm:$0xff]  }
  0x18   : > { %v268_v48 = vadd.f32 %v266_v39, %v264_v29  ;;  %v309_v49 = vadd.f32 %v307_v32, %v296_v42  ;;  %v339_v50 = vrot.slane %v259_v14, %v338_v6  ;;  %v629_v51 = vunpack.c.l.bf16 %v674_v38  ;;  %v640_v6 = vld [vmem:[%s783_s5] sm:$0xff]   ;;  %v681_v42 = vld [vmem:[%s783_s5 + $0x28] sm:$0xff]  }
  0x19   : > { %v297_v53 = vadd.f32 %v295_v43, %v284_v36  ;;  %v308_v54 = vmul.f32 %v618_v44, %v306_v23  ;;  %v321_v55 = vmul.f32 %v622_v45, %v319_v26  ;;  %v350_v56 = vrot.slane %v259_v14, %v349_v10 }
  0x1a   : > { %v271_v57 = vadd.f32 %v269_v40, %v268_v48  ;;  %v322_v58 = vadd.f32 %v320_v34, %v309_v49  ;;  %v340_v59 = vmul.f32 %v625_v46, %v339_v50  ;;  %v633_v60 = vunpack.c.l.bf16 %v675_v47 }
  0x1b   : > { %v310_v61 = vadd.f32 %v308_v54, %v297_v53  ;;  %v351_v62 = vmul.f32 %v629_v51, %v350_v56  ;;  %v363_v63 = vrot.slane %v259_v14, %v362_v11  ;;  %v637_v0 = vunpack.c.l.bf16 %v676_v52  ;;  %v678_v11 = vld [vmem:[%s783_s5 + $0x10] sm:$0xff]   ;;  %v683_v51 = vld [vmem:[%s783_s5 + $0x38] sm:$0xff]  }
  0x1c   : > { %v274_v1 = vadd.f32 %v272_v41, %v271_v57  ;;  %v376_v3 = vrot.slane %v259_v14, %v375_v12  ;;  %v626_v4 = vunpack.c.h.bf16 %v624_v33  ;;  %v630_v5 = vunpack.c.h.bf16 %v674_v38  ;;  %v677_v38 = vld [vmem:[%s783_s5 + $0x8] sm:$0xff]   ;;  %v679_v41 = vld [vmem:[%s783_s5 + $0x18] sm:$0xff]  }
  0x1d   : > { %v323_v7 = vadd.f32 %v321_v55, %v310_v61  ;;  %v353_v8 = vadd.f32 %v351_v62, %v340_v59  ;;  %v364_v9 = vmul.f32 %v633_v60, %v363_v63  ;;  %v634_v10 = vunpack.c.h.bf16 %v675_v47 }
  0x1e   : > { %v787_v13 = vrot.slane %v274_v1, %v741_v2  ;;  %v377_v16 = vmul.f32 %v637_v0, %v376_v3  ;;  %v341_v17 = vmul.f32 %v626_v4, %v339_v50  ;;  %v352_v18 = vmul.f32 %v630_v5, %v350_v56 }
  0x1f   : > { %v366_v12 = vadd.f32 %v364_v9, %v353_v8  ;;  %v365_v14 = vmul.f32 %v634_v10, %v363_v63  ;;  %v638_v20 = vunpack.c.h.bf16 %v676_v52  ;;  %v641_v21 = vunpack.c.l.bf16 %v640_v6 }
  0x20   : > { %v328_v23 = vmul.f32 %v787_v13, %v322_v58  ;;  %v329_v24 = vmul.f32 %v787_v13, %v323_v7  ;;  %v354_v25 = vadd.f32 %v352_v18, %v341_v17  ;;  %v396_v26 = vrot.slane %v756_v15, %v741_v2 }
  0x21   : > { %v379_v29 = vadd.f32 %v377_v16, %v366_v12  ;;  %v378_v30 = vmul.f32 %v638_v20, %v376_v3  ;;  %v649_v31 = vunpack.c.l.bf16 %v678_v11  ;;  %v657_v32 = vunpack.c.l.bf16 %v680_v19 }
  0x22   : > { %330 = vst [vmem:[%s796_s8] sm:$0xff] %v328_v23  ;;  %331 = vst [vmem:[%s796_s8 + $0x8] sm:$0xff] %v329_v24  ;;  %v367_v33 = vadd.f32 %v365_v14, %v354_v25  ;;  %v397_v34 = vmul.f32 %v641_v21, %v396_v26  ;;  %v665_v36 = vunpack.c.l.bf16 %v682_v22  ;;  %v642_v37 = vunpack.c.h.bf16 %v640_v6 }
  0x23   : > { %v381_v39 = vmul.f32 %v379_v29, %v787_v13  ;;  %v414_v40 = vmul.f32 %v649_v31, %v765_v27  ;;  %v435_v2 = vmul.f32 %v657_v32, %v768_v28  ;;  %v650_v15 = vunpack.c.h.bf16 %v678_v11 }
  0x24   : > { %v380_v43 = vadd.f32 %v378_v30, %v367_v33  ;;  %v456_v44 = vmul.f32 %v665_v36, %v772_v35  ;;  %v398_v45 = vmul.f32 %v642_v37, %v396_v26  ;;  %v658_v46 = vunpack.c.h.bf16 %v680_v19 }
  0x25   : > { %383 = vst [vmem:[%s796_s8 + $0x10] sm:$0xff] %v381_v39  ;;  %v418_v47 = vadd.f32 %v414_v40, %v397_v34  ;;  %v415_v48 = vmul.f32 %v650_v15, %v765_v27  ;;  %v666_v49 = vunpack.c.h.bf16 %v682_v22  ;;  %v645_v50 = vunpack.c.l.bf16 %v677_v38 }
  0x26   : > { %v382_v52 = vmul.f32 %v380_v43, %v787_v13  ;;  %v436_v53 = vmul.f32 %v658_v46, %v768_v28  ;;  %v653_v54 = vunpack.c.l.bf16 %v679_v41  ;;  %v661_v55 = vunpack.c.l.bf16 %v681_v42 }
  0x27   : > { %v439_v56 = vadd.f32 %v435_v2, %v418_v47  ;;  %v419_v57 = vadd.f32 %v415_v48, %v398_v45  ;;  %v457_v58 = vmul.f32 %v666_v49, %v772_v35  ;;  %v399_v59 = vmul.f32 %v645_v50, %v396_v26 }
  0x28   : > { %384 = vst [vmem:[%s796_s8 + $0x18] sm:$0xff] %v382_v52  ;;  %v416_v60 = vmul.f32 %v653_v54, %v765_v27  ;;  %v437_v61 = vmul.f32 %v661_v55, %v768_v28  ;;  %v669_v62 = vunpack.c.l.bf16 %v683_v51  ;;  %v646_v63 = vunpack.c.h.bf16 %v677_v38 }
  0x29   : > { %v460_v0 = vadd.f32 %v456_v44, %v439_v56  ;;  %v440_v1 = vadd.f32 %v436_v53, %v419_v57  ;;  %v654_v3 = vunpack.c.h.bf16 %v679_v41  ;;  %v662_v4 = vunpack.c.h.bf16 %v681_v42 }
  0x2a   : > { %v420_v5 = vadd.f32 %v416_v60, %v399_v59  ;;  %v458_v6 = vmul.f32 %v669_v62, %v772_v35  ;;  %v400_v7 = vmul.f32 %v646_v63, %v396_v26  ;;  %v670_v8 = vunpack.c.h.bf16 %v683_v51 }
  0x2b   : > { %v464_v9 = vmul.f32 %v460_v0, %v787_v13  ;;  %v461_v10 = vadd.f32 %v457_v58, %v440_v1  ;;  %v417_v16 = vmul.f32 %v654_v3, %v765_v27  ;;  %v438_v17 = vmul.f32 %v662_v4, %v768_v28 }
  0x2c   : > { %v441_v18 = vadd.f32 %v437_v61, %v420_v5  ;;  %v459_v12 = vmul.f32 %v670_v8, %v772_v35 }
  0x2d   : > { %468 = vst [vmem:[%s796_s8 + $0x20] sm:$0xff] %v464_v9  ;;  %v465_v11 = vmul.f32 %v461_v10, %v787_v13  ;;  %v421_v19 = vadd.f32 %v417_v16, %v400_v7 }
  0x2e   : > { %v462_v14 = vadd.f32 %v458_v6, %v441_v18 }
  0x2f   : > { %469 = vst [vmem:[%s796_s8 + $0x28] sm:$0xff] %v465_v11  ;;  %v442_v20 = vadd.f32 %v438_v17, %v421_v19 }
  0x30   : > { %v466_v21 = vmul.f32 %v462_v14, %v787_v13 }
  0x31   : > { %v463_v22 = vadd.f32 %v459_v12, %v442_v20 }
  0x32   : > { %470 = vst [vmem:[%s796_s8 + $0x30] sm:$0xff] %v466_v21 }
  0x33   : > { %v467_v23 = vmul.f32 %v463_v22, %v787_v13 }
  0x35   : > { %471 = vst [vmem:[%s796_s8 + $0x38] sm:$0xff] %v467_v23 }
  0x36 PF: > { %s14_s15 = sadd.s32 1, %s699_s15  }
  0x37   : > { %p11_p4 = scmp.ge.s32.totalorder %s14_s15, 4  }
  0x39   :  { %13 = sbr.rel (!%p11_p4) target bundleno = 1 (0x1), region = 84 }

</bundles_post_ra>
